<compile_context>
chip_gen: v7x
topology: tpu7x:2x2x1
jax: 0.10.0
libtpu: 0.0.40
codegen_flags: <defaults>
</compile_context>

<pallas_src>
import jax
import jax.numpy as jnp
from jax.experimental import pallas as pl
from jax.experimental.pallas import tpu as pltpu

_BN_EPS_SCALE = 1.0 / (1.0 + 1e-5) ** 0.5   # eval-mode BatchNorm1d with default running stats

# ---- packed GRU weight-block indices (each block is (H, 3H); gates lane-stacked r|z|n) ------
_L0F_WI, _L0F_WH, _L0B_WI, _L0B_WH = 0, 1, 2, 3
_L1F_WIF, _L1F_WIB, _L1F_WH = 4, 5, 6            # layer-1 W_ih split row-wise: fwd / bwd half
_L1B_WIF, _L1B_WIB, _L1B_WH = 7, 8, 9
# ---- packed GRU bias-row indices (each row is (3H,)) ---------------------------------------
_L0F_BI, _L0F_BH, _L0B_BI, _L0B_BH = 0, 1, 2, 3
_L1F_BI, _L1F_BH, _L1B_BI, _L1B_BH = 4, 5, 6, 7


# ---------------------------------------------------------------------------------------------
# One fused kernel = whole Critic forward for ONE batch element (grid axis = batch).
# ---------------------------------------------------------------------------------------------
def _critic_kernel(x_ref, gum_ref, encw_ref, encb_ref, gsrc_ref, gtgt_ref,
                   scat_ref, anorm_ref, gruw_ref, grub_ref,
                   rcwg_ref, rcwc_ref, rcb_ref,
                   gcnw1_ref, gcnb1_ref, gcnw2_ref, gcnb2_ref, out_ref):
    f32 = jnp.float32
    bf16 = jnp.bfloat16
    H = encw_ref.shape[1]

    def mxu(a16, w16):            # bf16 MXU operands, f32 accumulation
        return jnp.dot(a16, w16, preferred_element_type=f32)

    def fdot(a, b):               # exact f32 matmul (one-hot gather / scatter)
        return jnp.dot(a, b, preferred_element_type=f32)

    def gelu(v):
        # TODO(synk): tanh-approx GELU; PyTorch nn.GELU default is exact erf (~1e-3 diff).
        return jax.nn.gelu(v, approximate=True)

    def bias(i):                  # (1, 3H) bias row
        return grub_ref[i:i + 1, :]

    def split_gates(g):           # static lane slices of a 3H-wide result
        return g[:, :H], g[:, H:2 * H], g[:, 2 * H:]

    def gru_cell(gi, h_prev, wh_idx, bh_idx):
        """PyTorch GRU cell (gate order r,z,n); h_prev=None means zero initial state."""
        if h_prev is None:
            gh = bias(bh_idx)                                              # (1, 3H)
        else:
            gh = mxu(h_prev.astype(bf16), gruw_ref[wh_idx]) + bias(bh_idx)  # (E, 3H)
        gi_r, gi_z, gi_n = split_gates(gi)
        gh_r, gh_z, gh_n = split_gates(gh)
        r = jax.nn.sigmoid(gi_r + gh_r)
        z = jax.nn.sigmoid(gi_z + gh_z)
        n = jnp.tanh(gi_n + r * gh_n)
        h_new = (1.0 - z) * n
        if h_prev is not None:
            h_new = h_new + z * h_prev
        return h_new

    gsrc = gsrc_ref[...]          # (E, N) one-hot of source node per edge (segment mask)
    gtgt = gtgt_ref[...]          # (E, N) one-hot of target node per edge

    # ---- encoder: Dropout(eval)=id -> Linear -> BatchNorm1d(eval) -> GELU -------------------
    x = x_ref[0]                                                       # (N, F)
    h_nodes = gelu((mxu(x.astype(bf16), encw_ref[...]) + encb_ref[...]) * _BN_EPS_SCALE)

    # ---- gather edge endpoints (exact f32 one-hot matmuls; h never leaves VMEM) -------------
    x0 = fdot(gtgt, h_nodes)      # h_target rows -> GRU input at t=0   (E, H)
    x1 = fdot(gsrc, h_nodes)      # h_source rows -> GRU input at t=1   (E, H)
    x0b, x1b = x0.astype(bf16), x1.astype(bf16)

    # ---- 2-layer bidirectional GRU over the length-2 sequence (fully unrolled) --------------
    def in_proj(xb, wi_idx, bi_idx):        # fused 3H-wide input projection
        return mxu(xb, gruw_ref[wi_idx]) + bias(bi_idx)

    f0 = gru_cell(in_proj(x0b, _L0F_WI, _L0F_BI), None, _L0F_WH, _L0F_BH)
    f1 = gru_cell(in_proj(x1b, _L0F_WI, _L0F_BI), f0, _L0F_WH, _L0F_BH)
    b1 = gru_cell(in_proj(x1b, _L0B_WI, _L0B_BI), None, _L0B_WH, _L0B_BH)
    b0 = gru_cell(in_proj(x0b, _L0B_WI, _L0B_BI), b1, _L0B_WH, _L0B_BH)
    f0b, f1b = f0.astype(bf16), f1.astype(bf16)
    b0b, b1b = b0.astype(bf16), b1.astype(bf16)

    # layer 1: input y_t = [f_t | b_t]; W_ih split row-wise so no lane-concat is needed.
    # Only g0 (fwd,t=0), c1 (bwd,t=1), c0 (bwd,t=0) feed output[t=0]; fwd t=1 is never computed.
    g0 = gru_cell(mxu(f0b, gruw_ref[_L1F_WIF]) + mxu(b0b, gruw_ref[_L1F_WIB]) + bias(_L1F_BI),
                  None, _L1F_WH, _L1F_BH)
    c1 = gru_cell(mxu(f1b, gruw_ref[_L1B_WIF]) + mxu(b1b, gruw_ref[_L1B_WIB]) + bias(_L1B_BI),
                  None, _L1B_WH, _L1B_BH)
    c0 = gru_cell(mxu(f0b, gruw_ref[_L1B_WIF]) + mxu(b0b, gruw_ref[_L1B_WIB]) + bias(_L1B_BI),
                  c1, _L1B_WH, _L1B_BH)

    # ---- rnn_connect: Linear(2H -> 1) + GELU; width-1 result never leaves VMEM --------------
    h_hard = jnp.sum(g0 * rcwg_ref[...] + c0 * rcwc_ref[...], axis=1, keepdims=True)
    h_hard = gelu(h_hard + rcb_ref[...])                               # (E, 1)

    # ---- per-source-node softmax / gumbel-softmax (tau=0.1), lane-parallel over segments ----
    def seg_softmax(vals):                                             # vals: (E, 1)
        scores = jnp.where(gsrc > 0.0, vals, -1e30)                    # (E, N)
        seg_max = jnp.max(scores, axis=0, keepdims=True)               # (1, N) per-node max
        row_max = jnp.sum(gsrc * seg_max, axis=1, keepdims=True)       # (E, 1) map back per edge
        ex = jnp.exp(vals - row_max)                                   # (E, 1)
        seg_sum = jnp.sum(gsrc * ex, axis=0, keepdims=True)            # (1, N) per-node denom
        denom = jnp.sum(gsrc * seg_sum, axis=1, keepdims=True)         # (E, 1)
        return ex / denom

    w_soft = seg_softmax(h_hard)
    w_hard = seg_softmax((h_hard + gum_ref[0]) / 0.1)
    # NOTE: the reference also computes q/k/h_soft but discards them -> not computed at all.

    weighted = x1 * (w_soft * w_hard)                                  # (E, H)

    # ---- scatter-sum onto target nodes (exact f32 one-hot matmul) ---------------------------
    h_tsa = fdot(scat_ref[...], weighted)                              # (N, H)

    # ---- 2-layer GCN (bf16 aggregate + linear) and sum over nodes ---------------------------
    a_norm = anorm_ref[...]                                            # (N, N) bf16
    h1 = gelu(mxu(mxu(a_norm, h_tsa.astype(bf16)).astype(bf16), gcnw1_ref[...]) + gcnb1_ref[...])
    h2 = mxu(mxu(a_norm, h1.astype(bf16)).astype(bf16), gcnw2_ref[...]) + gcnb2_ref[...]
    out_ref[...] = jnp.sum(h2, axis=0, keepdims=True).reshape(out_ref.shape)


# ---------------------------------------------------------------------------------------------
# Wrapper: per-batch structural matrices + packed weights, grid over the batch.
# ---------------------------------------------------------------------------------------------
def critic_forward(observations, actions, edge_index, params, gumbel_key):
    f32, bf16 = jnp.float32, jnp.bfloat16
    B, N, _ = observations.shape
    H = params["enc_w"].shape[1]
    n_out = params["gcn_w2"].shape[1]
    tgt, src = edge_index[0], edge_index[1]
    E = src.shape[0]

    # encoder input, per batch: (B, N, state+action)
    x3d = jnp.concatenate([observations, actions.reshape(B, N, -1)], axis=2).astype(f32)

    # per-batch structural one-hots (graph shared across the batch)
    nodes = jnp.arange(N, dtype=jnp.int32)[None, :]
    g_src = (src[:, None] == nodes).astype(f32)      # (E, N)
    g_tgt = (tgt[:, None] == nodes).astype(f32)      # (E, N)
    scat = g_tgt.T                                   # (N, E) scatter over edge_index[0]

    # TODO(synk): GCN class is not given in the reference source; using a standard 2-layer GCN
    # (sym-normalized adjacency + self-loops, GELU between layers, eval-mode dropout off).
    A = jnp.zeros((N, N), f32).at[tgt, src].set(1.0) + jnp.eye(N, dtype=f32)
    dinv = 1.0 / jnp.sqrt(jnp.sum(A, axis=1))
    a_norm = (A * dinv[:, None] * dinv[None, :]).astype(bf16)

    # gumbel noise for the hard-attention path
    # TODO(synk): could be generated in-kernel with pltpu.prng_*; kept as a tiny HBM input.
    u = jax.random.uniform(gumbel_key, (B, E, 1), f32, 1e-20, 1.0)
    gumbel = -jnp.log(-jnp.log(u))

    # pack GRU weights: (10, H, 3H) bf16 blocks (gates lane-stacked), (8, 3H) f32 bias rows
    gru = params["tsa"]["gru"]
    wi0f, wh0f, bi0f, bh0f = gru["l0_fwd"]
    wi0b, wh0b, bi0b, bh0b = gru["l0_bwd"]
    wi1f, wh1f, bi1f, bh1f = gru["l1_fwd"]
    wi1b, wh1b, bi1b, bh1b = gru["l1_bwd"]
    gru_w = jnp.stack([wi0f, wh0f, wi0b, wh0b,
                       wi1f[:H], wi1f[H:], wh1f,
                       wi1b[:H], wi1b[H:], wh1b]).astype(bf16)
    gru_b = jnp.stack([bi0f, bh0f, bi0b, bh0b,
                       bi1f, bh1f, bi1b, bh1b]).astype(f32)

    # remaining dense weights (bf16 MXU operands, f32 biases)
    enc_w = params["enc_w"].astype(bf16)
    enc_b = params["enc_b"].reshape(1, H).astype(f32)
    rc_w = params["tsa"]["rc_w"]
    rc_wg = rc_w[:H, 0].reshape(1, H).astype(f32)
    rc_wc = rc_w[H:, 0].reshape(1, H).astype(f32)
    rc_b = params["tsa"]["rc_b"].reshape(1, 1).astype(f32)
    gcn_w1 = params["gcn_w1"].astype(bf16)
    gcn_b1 = params["gcn_b1"].reshape(1, H).astype(f32)
    gcn_w2 = params["gcn_w2"].astype(bf16)
    gcn_b2 = params["gcn_b2"].reshape(1, n_out).astype(f32)
    # NOTE: params["tsa"]["q_*"]/["k_*"] feed a value the reference forward discards -> dropped.

    batch_args = (x3d, gumbel)
    const_args = (enc_w, enc_b, g_src, g_tgt, scat, a_norm, gru_w, gru_b,
                  rc_wg, rc_wc, rc_b, gcn_w1, gcn_b1, gcn_w2, gcn_b2)

    def batch_spec(a):
        nd = a.ndim
        return pl.BlockSpec((1,) + a.shape[1:], lambda b, _nd=nd: (b,) + (0,) * (_nd - 1))

    def const_spec(a):           # constant block index -> fetched once, no per-step re-DMA
        nd = a.ndim
        return pl.BlockSpec(a.shape, lambda b, _nd=nd: (0,) * _nd)

    in_specs = [batch_spec(a) for a in batch_args] + [const_spec(a) for a in const_args]

    out = pl.pallas_call(
        _critic_kernel,
        out_shape=jax.ShapeDtypeStruct((B, 1, n_out), f32),
        grid=(B,),
        in_specs=in_specs,
        out_specs=pl.BlockSpec((1, 1, n_out), lambda b: (b, 0, 0)),
        compiler_params=pltpu.CompilerParams(
            dimension_semantics=("parallel",),
            vmem_limit_bytes=32 * 1024 * 1024),
    )(*batch_args, *const_args)
    return out.reshape(B, n_out)


# ---------------------------------------------------------------------------------------------
# Deterministic parameter construction (PyTorch-style U(-1/sqrt(fan_in), 1/sqrt(fan_in)))
# ---------------------------------------------------------------------------------------------
def _uniform(key, shape, fan_in):
    bound = 1.0 / (fan_in ** 0.5)
    return jax.random.uniform(key, shape, jnp.float32, -bound, bound)


def make_params(key, hidden, output_nums, state_nums, action_nums):
    H = hidden
    keys = iter(jax.random.split(key, 64))

    def gru_dir(in_size):
        return (
            _uniform(next(keys), (in_size, 3 * H), H),   # W_ih^T
            _uniform(next(keys), (H, 3 * H), H),         # W_hh^T
            _uniform(next(keys), (3 * H,), H),           # b_ih
            _uniform(next(keys), (3 * H,), H),           # b_hh
        )

    params = {
        "enc_w": _uniform(next(keys), (state_nums + action_nums, H), state_nums + action_nums),
        "enc_b": _uniform(next(keys), (H,), state_nums + action_nums),
        "tsa": {
            "gru": {
                "l0_fwd": gru_dir(H),
                "l0_bwd": gru_dir(H),
                "l1_fwd": gru_dir(2 * H),
                "l1_bwd": gru_dir(2 * H),
            },
            "rc_w": _uniform(next(keys), (2 * H, 1), 2 * H),
            "rc_b": _uniform(next(keys), (1,), 2 * H),
            # q / k exist in the module but feed an unused value in forward().
            "q_w": _uniform(next(keys), (H, H), H),
            "q_b": _uniform(next(keys), (H,), H),
            "k_w": _uniform(next(keys), (H, H), H),
            "k_b": _uniform(next(keys), (H,), H),
        },
        "gcn_w1": _uniform(next(keys), (H, H), H),
        "gcn_b1": _uniform(next(keys), (H,), H),
        "gcn_w2": _uniform(next(keys), (H, output_nums), H),
        "gcn_b2": _uniform(next(keys), (output_nums,), H),
    }
    return params


# ---------------------------------------------------------------------------------------------
if __name__ == "__main__":
    B, N = 2, 4                       # batch, node_nums
    state_nums, action_nums = 6, 2
    hidden_nums, output_nums = 32, 8

    root = jax.random.PRNGKey(0)
    k_param, k_obs, k_act, k_gumbel = jax.random.split(root, 4)

    params = make_params(k_param, hidden_nums, output_nums, state_nums, action_nums)

    observations = jax.random.normal(k_obs, (B, N, state_nums), jnp.float32)
    actions = jax.random.normal(k_act, (B, N, action_nums), jnp.float32)

    # fully-connected directed graph without self-loops: E = N*(N-1) = 12
    pairs = [(i, j) for i in range(N) for j in range(N) if i != j]
    edge_index = jnp.array(list(zip(*pairs)), dtype=jnp.int32)   # (2, 12)

    out = jax.jit(critic_forward)(observations, actions, edge_index, params, k_gumbel)
    out = jax.block_until_ready(out)
    assert out.shape == (B, output_nums), out.shape
    print("KERNEL_OK")
</pallas_src>

<mosaic_0001>
module attributes {stable_mosaic.version = 11 : i64} {
  func.func @_critic_kernel(%arg0: i32, %arg1: memref<1x4x8xf32, #tpu.memory_space<vmem>>, %arg2: memref<1x12x1xf32, #tpu.memory_space<vmem>>, %arg3: memref<8x32xbf16, #tpu.memory_space<vmem>>, %arg4: memref<1x32xf32, #tpu.memory_space<vmem>>, %arg5: memref<12x4xf32, #tpu.memory_space<vmem>>, %arg6: memref<12x4xf32, #tpu.memory_space<vmem>>, %arg7: memref<4x12xf32, #tpu.memory_space<vmem>>, %arg8: memref<4x4xbf16, #tpu.memory_space<vmem>>, %arg9: memref<10x32x96xbf16, #tpu.memory_space<vmem>>, %arg10: memref<8x96xf32, #tpu.memory_space<vmem>>, %arg11: memref<1x32xf32, #tpu.memory_space<vmem>>, %arg12: memref<1x32xf32, #tpu.memory_space<vmem>>, %arg13: memref<1x1xf32, #tpu.memory_space<vmem>>, %arg14: memref<32x32xbf16, #tpu.memory_space<vmem>>, %arg15: memref<1x32xf32, #tpu.memory_space<vmem>>, %arg16: memref<32x8xbf16, #tpu.memory_space<vmem>>, %arg17: memref<1x8xf32, #tpu.memory_space<vmem>>, %arg18: memref<1x1x8xf32, #tpu.memory_space<vmem>>) attributes {dimension_semantics = [#tpu.dimension_semantics<parallel>], iteration_bounds = array<i64: 2>, scalar_prefetch = 0 : i64, scratch_operands = 0 : i64, tpu.core_type = #tpu.core_type<tc>, window_params = [{transform_indices = @transform_0, window_bounds = array<i64: 1, 4, 8>}, {transform_indices = @transform_1, window_bounds = array<i64: 1, 12, 1>}, {pipeline_mode = #tpu.pipeline_mode<synchronous>, transform_indices = @transform_2, window_bounds = array<i64: 8, 32>}, {pipeline_mode = #tpu.pipeline_mode<synchronous>, transform_indices = @transform_3, window_bounds = array<i64: 1, 32>}, {pipeline_mode = #tpu.pipeline_mode<synchronous>, transform_indices = @transform_4, window_bounds = array<i64: 12, 4>}, {pipeline_mode = #tpu.pipeline_mode<synchronous>, transform_indices = @transform_5, window_bounds = array<i64: 12, 4>}, {pipeline_mode = #tpu.pipeline_mode<synchronous>, transform_indices = @transform_6, window_bounds = array<i64: 4, 12>}, {pipeline_mode = #tpu.pipeline_mode<synchronous>, transform_indices = @transform_7, window_bounds = array<i64: 4, 4>}, {pipeline_mode = #tpu.pipeline_mode<synchronous>, transform_indices = @transform_8, window_bounds = array<i64: 10, 32, 96>}, {pipeline_mode = #tpu.pipeline_mode<synchronous>, transform_indices = @transform_9, window_bounds = array<i64: 8, 96>}, {pipeline_mode = #tpu.pipeline_mode<synchronous>, transform_indices = @transform_10, window_bounds = array<i64: 1, 32>}, {pipeline_mode = #tpu.pipeline_mode<synchronous>, transform_indices = @transform_11, window_bounds = array<i64: 1, 32>}, {pipeline_mode = #tpu.pipeline_mode<synchronous>, transform_indices = @transform_12, window_bounds = array<i64: 1, 1>}, {pipeline_mode = #tpu.pipeline_mode<synchronous>, transform_indices = @transform_13, window_bounds = array<i64: 32, 32>}, {pipeline_mode = #tpu.pipeline_mode<synchronous>, transform_indices = @transform_14, window_bounds = array<i64: 1, 32>}, {pipeline_mode = #tpu.pipeline_mode<synchronous>, transform_indices = @transform_15, window_bounds = array<i64: 32, 8>}, {pipeline_mode = #tpu.pipeline_mode<synchronous>, transform_indices = @transform_16, window_bounds = array<i64: 1, 8>}, {transform_indices = @transform_17, window_bounds = array<i64: 1, 1, 8>}]} {
    %c0 = arith.constant 0 : index
    %c0_0 = arith.constant 0 : index
    %0 = vector.load %arg5[%c0, %c0_0] : memref<12x4xf32, #tpu.memory_space<vmem>>, vector<12x4xf32>
    %c0_1 = arith.constant 0 : index
    %c0_2 = arith.constant 0 : index
    %1 = vector.load %arg6[%c0_1, %c0_2] : memref<12x4xf32, #tpu.memory_space<vmem>>, vector<12x4xf32>
    %c0_3 = arith.constant 0 : index
    %c0_4 = arith.constant 0 : index
    %c0_5 = arith.constant 0 : index
    %2 = vector.load %arg1[%c0_3, %c0_4, %c0_5] : memref<1x4x8xf32, #tpu.memory_space<vmem>>, vector<1x4x8xf32>
    %3 = vector.shape_cast %2 : vector<1x4x8xf32> to vector<4x8xf32>
    %4 = arith.truncf %3 : vector<4x8xf32> to vector<4x8xbf16>
    %c0_6 = arith.constant 0 : index
    %c0_7 = arith.constant 0 : index
    %5 = vector.load %arg3[%c0_6, %c0_7] : memref<8x32xbf16, #tpu.memory_space<vmem>>, vector<8x32xbf16>
    %cst = arith.constant dense<0.000000e+00> : vector<4x32xf32>
    %6 = tpu.matmul %4, %5, %cst {dimension_numbers = #tpu.dot_dimension_numbers<[1], [0], [0], [1], [0, 0, 1, 1], [], []>} : vector<4x8xbf16>, vector<8x32xbf16>, vector<4x32xf32> -> vector<4x32xf32>
    %c0_8 = arith.constant 0 : index
    %c0_9 = arith.constant 0 : index
    %7 = vector.load %arg4[%c0_8, %c0_9] : memref<1x32xf32, #tpu.memory_space<vmem>>, vector<1x32xf32>
    %8 = vector.broadcast %7 : vector<1x32xf32> to vector<4x32xf32>
    %9 = arith.addf %6, %8 : vector<4x32xf32>
    %cst_10 = arith.constant 0.999994993 : f32
    %10 = vector.broadcast %cst_10 : f32 to vector<4x32xf32>
    %11 = arith.mulf %9, %10 : vector<4x32xf32>
    %12 = arith.mulf %11, %11 : vector<4x32xf32>
    %13 = arith.mulf %11, %12 : vector<4x32xf32>
    %cst_11 = arith.constant 4.471500e-02 : f32
    %14 = vector.broadcast %cst_11 : f32 to vector<4x32xf32>
    %15 = arith.mulf %14, %13 : vector<4x32xf32>
    %16 = arith.addf %11, %15 : vector<4x32xf32>
    %cst_12 = arith.constant 0.797884583 : f32
    %17 = vector.broadcast %cst_12 : f32 to vector<4x32xf32>
    %18 = arith.mulf %17, %16 : vector<4x32xf32>
    %19 = math.tanh %18 : vector<4x32xf32>
    %cst_13 = arith.constant 1.000000e+00 : f32
    %20 = vector.broadcast %cst_13 : f32 to vector<4x32xf32>
    %21 = arith.addf %20, %19 : vector<4x32xf32>
    %cst_14 = arith.constant 5.000000e-01 : f32
    %22 = vector.broadcast %cst_14 : f32 to vector<4x32xf32>
    %23 = arith.mulf %22, %21 : vector<4x32xf32>
    %24 = arith.mulf %11, %23 : vector<4x32xf32>
    %cst_15 = arith.constant dense<0.000000e+00> : vector<12x32xf32>
    %25 = tpu.matmul %1, %24, %cst_15 {dimension_numbers = #tpu.dot_dimension_numbers<[1], [0], [0], [1], [0, 0, 1, 1], [], []>} : vector<12x4xf32>, vector<4x32xf32>, vector<12x32xf32> -> vector<12x32xf32>
    %cst_16 = arith.constant dense<0.000000e+00> : vector<12x32xf32>
    %26 = tpu.matmul %0, %24, %cst_16 {dimension_numbers = #tpu.dot_dimension_numbers<[1], [0], [0], [1], [0, 0, 1, 1], [], []>} : vector<12x4xf32>, vector<4x32xf32>, vector<12x32xf32> -> vector<12x32xf32>
    %27 = arith.truncf %25 : vector<12x32xf32> to vector<12x32xbf16>
    %28 = arith.truncf %26 : vector<12x32xf32> to vector<12x32xbf16>
    %c0_17 = arith.constant 0 : index
    %c0_18 = arith.constant 0 : index
    %c0_19 = arith.constant 0 : index
    %29 = vector.load %arg9[%c0_17, %c0_18, %c0_19] : memref<10x32x96xbf16, #tpu.memory_space<vmem>>, vector<1x32x96xbf16>
    %30 = vector.shape_cast %29 : vector<1x32x96xbf16> to vector<32x96xbf16>
    %cst_20 = arith.constant dense<0.000000e+00> : vector<12x96xf32>
    %31 = tpu.matmul %27, %30, %cst_20 {dimension_numbers = #tpu.dot_dimension_numbers<[1], [0], [0], [1], [0, 0, 1, 1], [], []>} : vector<12x32xbf16>, vector<32x96xbf16>, vector<12x96xf32> -> vector<12x96xf32>
    %c0_21 = arith.constant 0 : index
    %c0_22 = arith.constant 0 : index
    %32 = vector.load %arg10[%c0_21, %c0_22] : memref<8x96xf32, #tpu.memory_space<vmem>>, vector<1x96xf32>
    %33 = vector.broadcast %32 : vector<1x96xf32> to vector<12x96xf32>
    %34 = arith.addf %31, %33 : vector<12x96xf32>
    %c1 = arith.constant 1 : index
    %c0_23 = arith.constant 0 : index
    %35 = vector.load %arg10[%c1, %c0_23] : memref<8x96xf32, #tpu.memory_space<vmem>>, vector<1x96xf32>
    %36 = vector.extract_strided_slice %34 {offsets = [0, 0], sizes = [12, 32], strides = [1, 1]} : vector<12x96xf32> to vector<12x32xf32>
    %37 = vector.extract_strided_slice %34 {offsets = [0, 32], sizes = [12, 32], strides = [1, 1]} : vector<12x96xf32> to vector<12x32xf32>
    %38 = vector.extract_strided_slice %34 {offsets = [0, 64], sizes = [12, 32], strides = [1, 1]} : vector<12x96xf32> to vector<12x32xf32>
    %39 = vector.extract_strided_slice %35 {offsets = [0, 0], sizes = [1, 32], strides = [1, 1]} : vector<1x96xf32> to vector<1x32xf32>
    %40 = vector.extract_strided_slice %35 {offsets = [0, 32], sizes = [1, 32], strides = [1, 1]} : vector<1x96xf32> to vector<1x32xf32>
    %41 = vector.extract_strided_slice %35 {offsets = [0, 64], sizes = [1, 32], strides = [1, 1]} : vector<1x96xf32> to vector<1x32xf32>
    %42 = vector.broadcast %39 : vector<1x32xf32> to vector<12x32xf32>
    %43 = arith.addf %36, %42 : vector<12x32xf32>
    %44 = arith.negf %43 : vector<12x32xf32>
    %45 = math.exp %44 : vector<12x32xf32>
    %cst_24 = arith.constant 1.000000e+00 : f32
    %46 = vector.broadcast %cst_24 : f32 to vector<12x32xf32>
    %47 = arith.addf %46, %45 : vector<12x32xf32>
    %48 = arith.divf %46, %47 : vector<12x32xf32>
    %49 = vector.broadcast %40 : vector<1x32xf32> to vector<12x32xf32>
    %50 = arith.addf %37, %49 : vector<12x32xf32>
    %51 = arith.negf %50 : vector<12x32xf32>
    %52 = math.exp %51 : vector<12x32xf32>
    %cst_25 = arith.constant 1.000000e+00 : f32
    %53 = vector.broadcast %cst_25 : f32 to vector<12x32xf32>
    %54 = arith.addf %53, %52 : vector<12x32xf32>
    %55 = arith.divf %53, %54 : vector<12x32xf32>
    %56 = vector.broadcast %41 : vector<1x32xf32> to vector<12x32xf32>
    %57 = arith.mulf %48, %56 : vector<12x32xf32>
    %58 = arith.addf %38, %57 : vector<12x32xf32>
    %59 = math.tanh %58 : vector<12x32xf32>
    %cst_26 = arith.constant 1.000000e+00 : f32
    %60 = vector.broadcast %cst_26 : f32 to vector<12x32xf32>
    %61 = arith.subf %60, %55 : vector<12x32xf32>
    %62 = arith.mulf %61, %59 : vector<12x32xf32>
    %c0_27 = arith.constant 0 : index
    %c0_28 = arith.constant 0 : index
    %c0_29 = arith.constant 0 : index
    %63 = vector.load %arg9[%c0_27, %c0_28, %c0_29] : memref<10x32x96xbf16, #tpu.memory_space<vmem>>, vector<1x32x96xbf16>
    %64 = vector.shape_cast %63 : vector<1x32x96xbf16> to vector<32x96xbf16>
    %cst_30 = arith.constant dense<0.000000e+00> : vector<12x96xf32>
    %65 = tpu.matmul %28, %64, %cst_30 {dimension_numbers = #tpu.dot_dimension_numbers<[1], [0], [0], [1], [0, 0, 1, 1], [], []>} : vector<12x32xbf16>, vector<32x96xbf16>, vector<12x96xf32> -> vector<12x96xf32>
    %c0_31 = arith.constant 0 : index
    %c0_32 = arith.constant 0 : index
    %66 = vector.load %arg10[%c0_31, %c0_32] : memref<8x96xf32, #tpu.memory_space<vmem>>, vector<1x96xf32>
    %67 = vector.broadcast %66 : vector<1x96xf32> to vector<12x96xf32>
    %68 = arith.addf %65, %67 : vector<12x96xf32>
    %69 = arith.truncf %62 : vector<12x32xf32> to vector<12x32xbf16>
    %c1_33 = arith.constant 1 : index
    %c0_34 = arith.constant 0 : index
    %c0_35 = arith.constant 0 : index
    %70 = vector.load %arg9[%c1_33, %c0_34, %c0_35] : memref<10x32x96xbf16, #tpu.memory_space<vmem>>, vector<1x32x96xbf16>
    %71 = vector.shape_cast %70 : vector<1x32x96xbf16> to vector<32x96xbf16>
    %cst_36 = arith.constant dense<0.000000e+00> : vector<12x96xf32>
    %72 = tpu.matmul %69, %71, %cst_36 {dimension_numbers = #tpu.dot_dimension_numbers<[1], [0], [0], [1], [0, 0, 1, 1], [], []>} : vector<12x32xbf16>, vector<32x96xbf16>, vector<12x96xf32> -> vector<12x96xf32>
    %c1_37 = arith.constant 1 : index
    %c0_38 = arith.constant 0 : index
    %73 = vector.load %arg10[%c1_37, %c0_38] : memref<8x96xf32, #tpu.memory_space<vmem>>, vector<1x96xf32>
    %74 = vector.broadcast %73 : vector<1x96xf32> to vector<12x96xf32>
    %75 = arith.addf %72, %74 : vector<12x96xf32>
    %76 = vector.extract_strided_slice %68 {offsets = [0, 0], sizes = [12, 32], strides = [1, 1]} : vector<12x96xf32> to vector<12x32xf32>
    %77 = vector.extract_strided_slice %68 {offsets = [0, 32], sizes = [12, 32], strides = [1, 1]} : vector<12x96xf32> to vector<12x32xf32>
    %78 = vector.extract_strided_slice %68 {offsets = [0, 64], sizes = [12, 32], strides = [1, 1]} : vector<12x96xf32> to vector<12x32xf32>
    %79 = vector.extract_strided_slice %75 {offsets = [0, 0], sizes = [12, 32], strides = [1, 1]} : vector<12x96xf32> to vector<12x32xf32>
    %80 = vector.extract_strided_slice %75 {offsets = [0, 32], sizes = [12, 32], strides = [1, 1]} : vector<12x96xf32> to vector<12x32xf32>
    %81 = vector.extract_strided_slice %75 {offsets = [0, 64], sizes = [12, 32], strides = [1, 1]} : vector<12x96xf32> to vector<12x32xf32>
    %82 = arith.addf %76, %79 : vector<12x32xf32>
    %83 = arith.negf %82 : vector<12x32xf32>
    %84 = math.exp %83 : vector<12x32xf32>
    %cst_39 = arith.constant 1.000000e+00 : f32
    %85 = vector.broadcast %cst_39 : f32 to vector<12x32xf32>
    %86 = arith.addf %85, %84 : vector<12x32xf32>
    %87 = arith.divf %85, %86 : vector<12x32xf32>
    %88 = arith.addf %77, %80 : vector<12x32xf32>
    %89 = arith.negf %88 : vector<12x32xf32>
    %90 = math.exp %89 : vector<12x32xf32>
    %cst_40 = arith.constant 1.000000e+00 : f32
    %91 = vector.broadcast %cst_40 : f32 to vector<12x32xf32>
    %92 = arith.addf %91, %90 : vector<12x32xf32>
    %93 = arith.divf %91, %92 : vector<12x32xf32>
    %94 = arith.mulf %87, %81 : vector<12x32xf32>
    %95 = arith.addf %78, %94 : vector<12x32xf32>
    %96 = math.tanh %95 : vector<12x32xf32>
    %cst_41 = arith.constant 1.000000e+00 : f32
    %97 = vector.broadcast %cst_41 : f32 to vector<12x32xf32>
    %98 = arith.subf %97, %93 : vector<12x32xf32>
    %99 = arith.mulf %98, %96 : vector<12x32xf32>
    %100 = arith.mulf %93, %62 : vector<12x32xf32>
    %101 = arith.addf %99, %100 : vector<12x32xf32>
    %c2 = arith.constant 2 : index
    %c0_42 = arith.constant 0 : index
    %c0_43 = arith.constant 0 : index
    %102 = vector.load %arg9[%c2, %c0_42, %c0_43] : memref<10x32x96xbf16, #tpu.memory_space<vmem>>, vector<1x32x96xbf16>
    %103 = vector.shape_cast %102 : vector<1x32x96xbf16> to vector<32x96xbf16>
    %cst_44 = arith.constant dense<0.000000e+00> : vector<12x96xf32>
    %104 = tpu.matmul %28, %103, %cst_44 {dimension_numbers = #tpu.dot_dimension_numbers<[1], [0], [0], [1], [0, 0, 1, 1], [], []>} : vector<12x32xbf16>, vector<32x96xbf16>, vector<12x96xf32> -> vector<12x96xf32>
    %c2_45 = arith.constant 2 : index
    %c0_46 = arith.constant 0 : index
    %105 = vector.load %arg10[%c2_45, %c0_46] : memref<8x96xf32, #tpu.memory_space<vmem>>, vector<1x96xf32>
    %106 = vector.broadcast %105 : vector<1x96xf32> to vector<12x96xf32>
    %107 = arith.addf %104, %106 : vector<12x96xf32>
    %c3 = arith.constant 3 : index
    %c0_47 = arith.constant 0 : index
    %108 = vector.load %arg10[%c3, %c0_47] : memref<8x96xf32, #tpu.memory_space<vmem>>, vector<1x96xf32>
    %109 = vector.extract_strided_slice %107 {offsets = [0, 0], sizes = [12, 32], strides = [1, 1]} : vector<12x96xf32> to vector<12x32xf32>
    %110 = vector.extract_strided_slice %107 {offsets = [0, 32], sizes = [12, 32], strides = [1, 1]} : vector<12x96xf32> to vector<12x32xf32>
    %111 = vector.extract_strided_slice %107 {offsets = [0, 64], sizes = [12, 32], strides = [1, 1]} : vector<12x96xf32> to vector<12x32xf32>
    %112 = vector.extract_strided_slice %108 {offsets = [0, 0], sizes = [1, 32], strides = [1, 1]} : vector<1x96xf32> to vector<1x32xf32>
    %113 = vector.extract_strided_slice %108 {offsets = [0, 32], sizes = [1, 32], strides = [1, 1]} : vector<1x96xf32> to vector<1x32xf32>
    %114 = vector.extract_strided_slice %108 {offsets = [0, 64], sizes = [1, 32], strides = [1, 1]} : vector<1x96xf32> to vector<1x32xf32>
    %115 = vector.broadcast %112 : vector<1x32xf32> to vector<12x32xf32>
    %116 = arith.addf %109, %115 : vector<12x32xf32>
    %117 = arith.negf %116 : vector<12x32xf32>
    %118 = math.exp %117 : vector<12x32xf32>
    %cst_48 = arith.constant 1.000000e+00 : f32
    %119 = vector.broadcast %cst_48 : f32 to vector<12x32xf32>
    %120 = arith.addf %119, %118 : vector<12x32xf32>
    %121 = arith.divf %119, %120 : vector<12x32xf32>
    %122 = vector.broadcast %113 : vector<1x32xf32> to vector<12x32xf32>
    %123 = arith.addf %110, %122 : vector<12x32xf32>
    %124 = arith.negf %123 : vector<12x32xf32>
    %125 = math.exp %124 : vector<12x32xf32>
    %cst_49 = arith.constant 1.000000e+00 : f32
    %126 = vector.broadcast %cst_49 : f32 to vector<12x32xf32>
    %127 = arith.addf %126, %125 : vector<12x32xf32>
    %128 = arith.divf %126, %127 : vector<12x32xf32>
    %129 = vector.broadcast %114 : vector<1x32xf32> to vector<12x32xf32>
    %130 = arith.mulf %121, %129 : vector<12x32xf32>
    %131 = arith.addf %111, %130 : vector<12x32xf32>
    %132 = math.tanh %131 : vector<12x32xf32>
    %cst_50 = arith.constant 1.000000e+00 : f32
    %133 = vector.broadcast %cst_50 : f32 to vector<12x32xf32>
    %134 = arith.subf %133, %128 : vector<12x32xf32>
    %135 = arith.mulf %134, %132 : vector<12x32xf32>
    %c2_51 = arith.constant 2 : index
    %c0_52 = arith.constant 0 : index
    %c0_53 = arith.constant 0 : index
    %136 = vector.load %arg9[%c2_51, %c0_52, %c0_53] : memref<10x32x96xbf16, #tpu.memory_space<vmem>>, vector<1x32x96xbf16>
    %137 = vector.shape_cast %136 : vector<1x32x96xbf16> to vector<32x96xbf16>
    %cst_54 = arith.constant dense<0.000000e+00> : vector<12x96xf32>
    %138 = tpu.matmul %27, %137, %cst_54 {dimension_numbers = #tpu.dot_dimension_numbers<[1], [0], [0], [1], [0, 0, 1, 1], [], []>} : vector<12x32xbf16>, vector<32x96xbf16>, vector<12x96xf32> -> vector<12x96xf32>
    %c2_55 = arith.constant 2 : index
    %c0_56 = arith.constant 0 : index
    %139 = vector.load %arg10[%c2_55, %c0_56] : memref<8x96xf32, #tpu.memory_space<vmem>>, vector<1x96xf32>
    %140 = vector.broadcast %139 : vector<1x96xf32> to vector<12x96xf32>
    %141 = arith.addf %138, %140 : vector<12x96xf32>
    %142 = arith.truncf %135 : vector<12x32xf32> to vector<12x32xbf16>
    %c3_57 = arith.constant 3 : index
    %c0_58 = arith.constant 0 : index
    %c0_59 = arith.constant 0 : index
    %143 = vector.load %arg9[%c3_57, %c0_58, %c0_59] : memref<10x32x96xbf16, #tpu.memory_space<vmem>>, vector<1x32x96xbf16>
    %144 = vector.shape_cast %143 : vector<1x32x96xbf16> to vector<32x96xbf16>
    %cst_60 = arith.constant dense<0.000000e+00> : vector<12x96xf32>
    %145 = tpu.matmul %142, %144, %cst_60 {dimension_numbers = #tpu.dot_dimension_numbers<[1], [0], [0], [1], [0, 0, 1, 1], [], []>} : vector<12x32xbf16>, vector<32x96xbf16>, vector<12x96xf32> -> vector<12x96xf32>
    %c3_61 = arith.constant 3 : index
    %c0_62 = arith.constant 0 : index
    %146 = vector.load %arg10[%c3_61, %c0_62] : memref<8x96xf32, #tpu.memory_space<vmem>>, vector<1x96xf32>
    %147 = vector.broadcast %146 : vector<1x96xf32> to vector<12x96xf32>
    %148 = arith.addf %145, %147 : vector<12x96xf32>
    %149 = vector.extract_strided_slice %141 {offsets = [0, 0], sizes = [12, 32], strides = [1, 1]} : vector<12x96xf32> to vector<12x32xf32>
    %150 = vector.extract_strided_slice %141 {offsets = [0, 32], sizes = [12, 32], strides = [1, 1]} : vector<12x96xf32> to vector<12x32xf32>
    %151 = vector.extract_strided_slice %141 {offsets = [0, 64], sizes = [12, 32], strides = [1, 1]} : vector<12x96xf32> to vector<12x32xf32>
    %152 = vector.extract_strided_slice %148 {offsets = [0, 0], sizes = [12, 32], strides = [1, 1]} : vector<12x96xf32> to vector<12x32xf32>
    %153 = vector.extract_strided_slice %148 {offsets = [0, 32], sizes = [12, 32], strides = [1, 1]} : vector<12x96xf32> to vector<12x32xf32>
    %154 = vector.extract_strided_slice %148 {offsets = [0, 64], sizes = [12, 32], strides = [1, 1]} : vector<12x96xf32> to vector<12x32xf32>
    %155 = arith.addf %149, %152 : vector<12x32xf32>
    %156 = arith.negf %155 : vector<12x32xf32>
    %157 = math.exp %156 : vector<12x32xf32>
    %cst_63 = arith.constant 1.000000e+00 : f32
    %158 = vector.broadcast %cst_63 : f32 to vector<12x32xf32>
    %159 = arith.addf %158, %157 : vector<12x32xf32>
    %160 = arith.divf %158, %159 : vector<12x32xf32>
    %161 = arith.addf %150, %153 : vector<12x32xf32>
    %162 = arith.negf %161 : vector<12x32xf32>
    %163 = math.exp %162 : vector<12x32xf32>
    %cst_64 = arith.constant 1.000000e+00 : f32
    %164 = vector.broadcast %cst_64 : f32 to vector<12x32xf32>
    %165 = arith.addf %164, %163 : vector<12x32xf32>
    %166 = arith.divf %164, %165 : vector<12x32xf32>
    %167 = arith.mulf %160, %154 : vector<12x32xf32>
    %168 = arith.addf %151, %167 : vector<12x32xf32>
    %169 = math.tanh %168 : vector<12x32xf32>
    %cst_65 = arith.constant 1.000000e+00 : f32
    %170 = vector.broadcast %cst_65 : f32 to vector<12x32xf32>
    %171 = arith.subf %170, %166 : vector<12x32xf32>
    %172 = arith.mulf %171, %169 : vector<12x32xf32>
    %173 = arith.mulf %166, %135 : vector<12x32xf32>
    %174 = arith.addf %172, %173 : vector<12x32xf32>
    %175 = arith.truncf %62 : vector<12x32xf32> to vector<12x32xbf16>
    %176 = arith.truncf %101 : vector<12x32xf32> to vector<12x32xbf16>
    %177 = arith.truncf %174 : vector<12x32xf32> to vector<12x32xbf16>
    %178 = arith.truncf %135 : vector<12x32xf32> to vector<12x32xbf16>
    %c4 = arith.constant 4 : index
    %c0_66 = arith.constant 0 : index
    %c0_67 = arith.constant 0 : index
    %179 = vector.load %arg9[%c4, %c0_66, %c0_67] : memref<10x32x96xbf16, #tpu.memory_space<vmem>>, vector<1x32x96xbf16>
    %180 = vector.shape_cast %179 : vector<1x32x96xbf16> to vector<32x96xbf16>
    %cst_68 = arith.constant dense<0.000000e+00> : vector<12x96xf32>
    %181 = tpu.matmul %175, %180, %cst_68 {dimension_numbers = #tpu.dot_dimension_numbers<[1], [0], [0], [1], [0, 0, 1, 1], [], []>} : vector<12x32xbf16>, vector<32x96xbf16>, vector<12x96xf32> -> vector<12x96xf32>
    %c5 = arith.constant 5 : index
    %c0_69 = arith.constant 0 : index
    %c0_70 = arith.constant 0 : index
    %182 = vector.load %arg9[%c5, %c0_69, %c0_70] : memref<10x32x96xbf16, #tpu.memory_space<vmem>>, vector<1x32x96xbf16>
    %183 = vector.shape_cast %182 : vector<1x32x96xbf16> to vector<32x96xbf16>
    %cst_71 = arith.constant dense<0.000000e+00> : vector<12x96xf32>
    %184 = tpu.matmul %177, %183, %cst_71 {dimension_numbers = #tpu.dot_dimension_numbers<[1], [0], [0], [1], [0, 0, 1, 1], [], []>} : vector<12x32xbf16>, vector<32x96xbf16>, vector<12x96xf32> -> vector<12x96xf32>
    %185 = arith.addf %181, %184 : vector<12x96xf32>
    %c4_72 = arith.constant 4 : index
    %c0_73 = arith.constant 0 : index
    %186 = vector.load %arg10[%c4_72, %c0_73] : memref<8x96xf32, #tpu.memory_space<vmem>>, vector<1x96xf32>
    %187 = vector.broadcast %186 : vector<1x96xf32> to vector<12x96xf32>
    %188 = arith.addf %185, %187 : vector<12x96xf32>
    %c5_74 = arith.constant 5 : index
    %c0_75 = arith.constant 0 : index
    %189 = vector.load %arg10[%c5_74, %c0_75] : memref<8x96xf32, #tpu.memory_space<vmem>>, vector<1x96xf32>
    %190 = vector.extract_strided_slice %188 {offsets = [0, 0], sizes = [12, 32], strides = [1, 1]} : vector<12x96xf32> to vector<12x32xf32>
    %191 = vector.extract_strided_slice %188 {offsets = [0, 32], sizes = [12, 32], strides = [1, 1]} : vector<12x96xf32> to vector<12x32xf32>
    %192 = vector.extract_strided_slice %188 {offsets = [0, 64], sizes = [12, 32], strides = [1, 1]} : vector<12x96xf32> to vector<12x32xf32>
    %193 = vector.extract_strided_slice %189 {offsets = [0, 0], sizes = [1, 32], strides = [1, 1]} : vector<1x96xf32> to vector<1x32xf32>
    %194 = vector.extract_strided_slice %189 {offsets = [0, 32], sizes = [1, 32], strides = [1, 1]} : vector<1x96xf32> to vector<1x32xf32>
    %195 = vector.extract_strided_slice %189 {offsets = [0, 64], sizes = [1, 32], strides = [1, 1]} : vector<1x96xf32> to vector<1x32xf32>
    %196 = vector.broadcast %193 : vector<1x32xf32> to vector<12x32xf32>
    %197 = arith.addf %190, %196 : vector<12x32xf32>
    %198 = arith.negf %197 : vector<12x32xf32>
    %199 = math.exp %198 : vector<12x32xf32>
    %cst_76 = arith.constant 1.000000e+00 : f32
    %200 = vector.broadcast %cst_76 : f32 to vector<12x32xf32>
    %201 = arith.addf %200, %199 : vector<12x32xf32>
    %202 = arith.divf %200, %201 : vector<12x32xf32>
    %203 = vector.broadcast %194 : vector<1x32xf32> to vector<12x32xf32>
    %204 = arith.addf %191, %203 : vector<12x32xf32>
    %205 = arith.negf %204 : vector<12x32xf32>
    %206 = math.exp %205 : vector<12x32xf32>
    %cst_77 = arith.constant 1.000000e+00 : f32
    %207 = vector.broadcast %cst_77 : f32 to vector<12x32xf32>
    %208 = arith.addf %207, %206 : vector<12x32xf32>
    %209 = arith.divf %207, %208 : vector<12x32xf32>
    %210 = vector.broadcast %195 : vector<1x32xf32> to vector<12x32xf32>
    %211 = arith.mulf %202, %210 : vector<12x32xf32>
    %212 = arith.addf %192, %211 : vector<12x32xf32>
    %213 = math.tanh %212 : vector<12x32xf32>
    %cst_78 = arith.constant 1.000000e+00 : f32
    %214 = vector.broadcast %cst_78 : f32 to vector<12x32xf32>
    %215 = arith.subf %214, %209 : vector<12x32xf32>
    %216 = arith.mulf %215, %213 : vector<12x32xf32>
    %c7 = arith.constant 7 : index
    %c0_79 = arith.constant 0 : index
    %c0_80 = arith.constant 0 : index
    %217 = vector.load %arg9[%c7, %c0_79, %c0_80] : memref<10x32x96xbf16, #tpu.memory_space<vmem>>, vector<1x32x96xbf16>
    %218 = vector.shape_cast %217 : vector<1x32x96xbf16> to vector<32x96xbf16>
    %cst_81 = arith.constant dense<0.000000e+00> : vector<12x96xf32>
    %219 = tpu.matmul %176, %218, %cst_81 {dimension_numbers = #tpu.dot_dimension_numbers<[1], [0], [0], [1], [0, 0, 1, 1], [], []>} : vector<12x32xbf16>, vector<32x96xbf16>, vector<12x96xf32> -> vector<12x96xf32>
    %c8 = arith.constant 8 : index
    %c0_82 = arith.constant 0 : index
    %c0_83 = arith.constant 0 : index
    %220 = vector.load %arg9[%c8, %c0_82, %c0_83] : memref<10x32x96xbf16, #tpu.memory_space<vmem>>, vector<1x32x96xbf16>
    %221 = vector.shape_cast %220 : vector<1x32x96xbf16> to vector<32x96xbf16>
    %cst_84 = arith.constant dense<0.000000e+00> : vector<12x96xf32>
    %222 = tpu.matmul %178, %221, %cst_84 {dimension_numbers = #tpu.dot_dimension_numbers<[1], [0], [0], [1], [0, 0, 1, 1], [], []>} : vector<12x32xbf16>, vector<32x96xbf16>, vector<12x96xf32> -> vector<12x96xf32>
    %223 = arith.addf %219, %222 : vector<12x96xf32>
    %c6 = arith.constant 6 : index
    %c0_85 = arith.constant 0 : index
    %224 = vector.load %arg10[%c6, %c0_85] : memref<8x96xf32, #tpu.memory_space<vmem>>, vector<1x96xf32>
    %225 = vector.broadcast %224 : vector<1x96xf32> to vector<12x96xf32>
    %226 = arith.addf %223, %225 : vector<12x96xf32>
    %c7_86 = arith.constant 7 : index
    %c0_87 = arith.constant 0 : index
    %227 = vector.load %arg10[%c7_86, %c0_87] : memref<8x96xf32, #tpu.memory_space<vmem>>, vector<1x96xf32>
    %228 = vector.extract_strided_slice %226 {offsets = [0, 0], sizes = [12, 32], strides = [1, 1]} : vector<12x96xf32> to vector<12x32xf32>
    %229 = vector.extract_strided_slice %226 {offsets = [0, 32], sizes = [12, 32], strides = [1, 1]} : vector<12x96xf32> to vector<12x32xf32>
    %230 = vector.extract_strided_slice %226 {offsets = [0, 64], sizes = [12, 32], strides = [1, 1]} : vector<12x96xf32> to vector<12x32xf32>
    %231 = vector.extract_strided_slice %227 {offsets = [0, 0], sizes = [1, 32], strides = [1, 1]} : vector<1x96xf32> to vector<1x32xf32>
    %232 = vector.extract_strided_slice %227 {offsets = [0, 32], sizes = [1, 32], strides = [1, 1]} : vector<1x96xf32> to vector<1x32xf32>
    %233 = vector.extract_strided_slice %227 {offsets = [0, 64], sizes = [1, 32], strides = [1, 1]} : vector<1x96xf32> to vector<1x32xf32>
    %234 = vector.broadcast %231 : vector<1x32xf32> to vector<12x32xf32>
    %235 = arith.addf %228, %234 : vector<12x32xf32>
    %236 = arith.negf %235 : vector<12x32xf32>
    %237 = math.exp %236 : vector<12x32xf32>
    %cst_88 = arith.constant 1.000000e+00 : f32
    %238 = vector.broadcast %cst_88 : f32 to vector<12x32xf32>
    %239 = arith.addf %238, %237 : vector<12x32xf32>
    %240 = arith.divf %238, %239 : vector<12x32xf32>
    %241 = vector.broadcast %232 : vector<1x32xf32> to vector<12x32xf32>
    %242 = arith.addf %229, %241 : vector<12x32xf32>
    %243 = arith.negf %242 : vector<12x32xf32>
    %244 = math.exp %243 : vector<12x32xf32>
    %cst_89 = arith.constant 1.000000e+00 : f32
    %245 = vector.broadcast %cst_89 : f32 to vector<12x32xf32>
    %246 = arith.addf %245, %244 : vector<12x32xf32>
    %247 = arith.divf %245, %246 : vector<12x32xf32>
    %248 = vector.broadcast %233 : vector<1x32xf32> to vector<12x32xf32>
    %249 = arith.mulf %240, %248 : vector<12x32xf32>
    %250 = arith.addf %230, %249 : vector<12x32xf32>
    %251 = math.tanh %250 : vector<12x32xf32>
    %cst_90 = arith.constant 1.000000e+00 : f32
    %252 = vector.broadcast %cst_90 : f32 to vector<12x32xf32>
    %253 = arith.subf %252, %247 : vector<12x32xf32>
    %254 = arith.mulf %253, %251 : vector<12x32xf32>
    %c7_91 = arith.constant 7 : index
    %c0_92 = arith.constant 0 : index
    %c0_93 = arith.constant 0 : index
    %255 = vector.load %arg9[%c7_91, %c0_92, %c0_93] : memref<10x32x96xbf16, #tpu.memory_space<vmem>>, vector<1x32x96xbf16>
    %256 = vector.shape_cast %255 : vector<1x32x96xbf16> to vector<32x96xbf16>
    %cst_94 = arith.constant dense<0.000000e+00> : vector<12x96xf32>
    %257 = tpu.matmul %175, %256, %cst_94 {dimension_numbers = #tpu.dot_dimension_numbers<[1], [0], [0], [1], [0, 0, 1, 1], [], []>} : vector<12x32xbf16>, vector<32x96xbf16>, vector<12x96xf32> -> vector<12x96xf32>
    %c8_95 = arith.constant 8 : index
    %c0_96 = arith.constant 0 : index
    %c0_97 = arith.constant 0 : index
    %258 = vector.load %arg9[%c8_95, %c0_96, %c0_97] : memref<10x32x96xbf16, #tpu.memory_space<vmem>>, vector<1x32x96xbf16>
    %259 = vector.shape_cast %258 : vector<1x32x96xbf16> to vector<32x96xbf16>
    %cst_98 = arith.constant dense<0.000000e+00> : vector<12x96xf32>
    %260 = tpu.matmul %177, %259, %cst_98 {dimension_numbers = #tpu.dot_dimension_numbers<[1], [0], [0], [1], [0, 0, 1, 1], [], []>} : vector<12x32xbf16>, vector<32x96xbf16>, vector<12x96xf32> -> vector<12x96xf32>
    %261 = arith.addf %257, %260 : vector<12x96xf32>
    %c6_99 = arith.constant 6 : index
    %c0_100 = arith.constant 0 : index
    %262 = vector.load %arg10[%c6_99, %c0_100] : memref<8x96xf32, #tpu.memory_space<vmem>>, vector<1x96xf32>
    %263 = vector.broadcast %262 : vector<1x96xf32> to vector<12x96xf32>
    %264 = arith.addf %261, %263 : vector<12x96xf32>
    %265 = arith.truncf %254 : vector<12x32xf32> to vector<12x32xbf16>
    %c9 = arith.constant 9 : index
    %c0_101 = arith.constant 0 : index
    %c0_102 = arith.constant 0 : index
    %266 = vector.load %arg9[%c9, %c0_101, %c0_102] : memref<10x32x96xbf16, #tpu.memory_space<vmem>>, vector<1x32x96xbf16>
    %267 = vector.shape_cast %266 : vector<1x32x96xbf16> to vector<32x96xbf16>
    %cst_103 = arith.constant dense<0.000000e+00> : vector<12x96xf32>
    %268 = tpu.matmul %265, %267, %cst_103 {dimension_numbers = #tpu.dot_dimension_numbers<[1], [0], [0], [1], [0, 0, 1, 1], [], []>} : vector<12x32xbf16>, vector<32x96xbf16>, vector<12x96xf32> -> vector<12x96xf32>
    %c7_104 = arith.constant 7 : index
    %c0_105 = arith.constant 0 : index
    %269 = vector.load %arg10[%c7_104, %c0_105] : memref<8x96xf32, #tpu.memory_space<vmem>>, vector<1x96xf32>
    %270 = vector.broadcast %269 : vector<1x96xf32> to vector<12x96xf32>
    %271 = arith.addf %268, %270 : vector<12x96xf32>
    %272 = vector.extract_strided_slice %264 {offsets = [0, 0], sizes = [12, 32], strides = [1, 1]} : vector<12x96xf32> to vector<12x32xf32>
    %273 = vector.extract_strided_slice %264 {offsets = [0, 32], sizes = [12, 32], strides = [1, 1]} : vector<12x96xf32> to vector<12x32xf32>
    %274 = vector.extract_strided_slice %264 {offsets = [0, 64], sizes = [12, 32], strides = [1, 1]} : vector<12x96xf32> to vector<12x32xf32>
    %275 = vector.extract_strided_slice %271 {offsets = [0, 0], sizes = [12, 32], strides = [1, 1]} : vector<12x96xf32> to vector<12x32xf32>
    %276 = vector.extract_strided_slice %271 {offsets = [0, 32], sizes = [12, 32], strides = [1, 1]} : vector<12x96xf32> to vector<12x32xf32>
    %277 = vector.extract_strided_slice %271 {offsets = [0, 64], sizes = [12, 32], strides = [1, 1]} : vector<12x96xf32> to vector<12x32xf32>
    %278 = arith.addf %272, %275 : vector<12x32xf32>
    %279 = arith.negf %278 : vector<12x32xf32>
    %280 = math.exp %279 : vector<12x32xf32>
    %cst_106 = arith.constant 1.000000e+00 : f32
    %281 = vector.broadcast %cst_106 : f32 to vector<12x32xf32>
    %282 = arith.addf %281, %280 : vector<12x32xf32>
    %283 = arith.divf %281, %282 : vector<12x32xf32>
    %284 = arith.addf %273, %276 : vector<12x32xf32>
    %285 = arith.negf %284 : vector<12x32xf32>
    %286 = math.exp %285 : vector<12x32xf32>
    %cst_107 = arith.constant 1.000000e+00 : f32
    %287 = vector.broadcast %cst_107 : f32 to vector<12x32xf32>
    %288 = arith.addf %287, %286 : vector<12x32xf32>
    %289 = arith.divf %287, %288 : vector<12x32xf32>
    %290 = arith.mulf %283, %277 : vector<12x32xf32>
    %291 = arith.addf %274, %290 : vector<12x32xf32>
    %292 = math.tanh %291 : vector<12x32xf32>
    %cst_108 = arith.constant 1.000000e+00 : f32
    %293 = vector.broadcast %cst_108 : f32 to vector<12x32xf32>
    %294 = arith.subf %293, %289 : vector<12x32xf32>
    %295 = arith.mulf %294, %292 : vector<12x32xf32>
    %296 = arith.mulf %289, %254 : vector<12x32xf32>
    %297 = arith.addf %295, %296 : vector<12x32xf32>
    %c0_109 = arith.constant 0 : index
    %c0_110 = arith.constant 0 : index
    %298 = vector.load %arg11[%c0_109, %c0_110] : memref<1x32xf32, #tpu.memory_space<vmem>>, vector<1x32xf32>
    %299 = vector.broadcast %298 : vector<1x32xf32> to vector<12x32xf32>
    %300 = arith.mulf %216, %299 : vector<12x32xf32>
    %c0_111 = arith.constant 0 : index
    %c0_112 = arith.constant 0 : index
    %301 = vector.load %arg12[%c0_111, %c0_112] : memref<1x32xf32, #tpu.memory_space<vmem>>, vector<1x32xf32>
    %302 = vector.broadcast %301 : vector<1x32xf32> to vector<12x32xf32>
    %303 = arith.mulf %297, %302 : vector<12x32xf32>
    %304 = arith.addf %300, %303 : vector<12x32xf32>
    %cst_113 = arith.constant dense<0.000000e+00> : vector<12xf32>
    %305 = vector.multi_reduction <add>, %304, %cst_113 [1] : vector<12x32xf32> to vector<12xf32>
    %306 = vector.shape_cast %305 : vector<12xf32> to vector<12x1xf32>
    %c0_114 = arith.constant 0 : index
    %c0_115 = arith.constant 0 : index
    %307 = vector.load %arg13[%c0_114, %c0_115] : memref<1x1xf32, #tpu.memory_space<vmem>>, vector<1x1xf32>
    %308 = vector.broadcast %307 : vector<1x1xf32> to vector<12x1xf32>
    %309 = arith.addf %306, %308 : vector<12x1xf32>
    %310 = arith.mulf %309, %309 : vector<12x1xf32>
    %311 = arith.mulf %309, %310 : vector<12x1xf32>
    %cst_116 = arith.constant 4.471500e-02 : f32
    %312 = vector.broadcast %cst_116 : f32 to vector<12x1xf32>
    %313 = arith.mulf %312, %311 : vector<12x1xf32>
    %314 = arith.addf %309, %313 : vector<12x1xf32>
    %cst_117 = arith.constant 0.797884583 : f32
    %315 = vector.broadcast %cst_117 : f32 to vector<12x1xf32>
    %316 = arith.mulf %315, %314 : vector<12x1xf32>
    %317 = math.tanh %316 : vector<12x1xf32>
    %cst_118 = arith.constant 1.000000e+00 : f32
    %318 = vector.broadcast %cst_118 : f32 to vector<12x1xf32>
    %319 = arith.addf %318, %317 : vector<12x1xf32>
    %cst_119 = arith.constant 5.000000e-01 : f32
    %320 = vector.broadcast %cst_119 : f32 to vector<12x1xf32>
    %321 = arith.mulf %320, %319 : vector<12x1xf32>
    %322 = arith.mulf %309, %321 : vector<12x1xf32>
    %cst_120 = arith.constant 0.000000e+00 : f32
    %323 = vector.broadcast %cst_120 : f32 to vector<12x4xf32>
    %324 = arith.cmpf ogt, %0, %323 : vector<12x4xf32>
    %cst_121 = arith.constant -1.000000e+30 : f32
    %325 = vector.shape_cast %322 : vector<12x1xf32> to vector<12x1xf32>
    %326 = vector.broadcast %325 : vector<12x1xf32> to vector<12x4xf32>
    %327 = vector.broadcast %cst_121 : f32 to vector<12x4xf32>
    %328 = arith.select %324, %326, %327 : vector<12x4xi1>, vector<12x4xf32>
    %cst_122 = arith.constant dense<0xFF800000> : vector<4xf32>
    %329 = vector.multi_reduction <maximumf>, %328, %cst_122 [0] : vector<12x4xf32> to vector<4xf32>
    %330 = vector.shape_cast %329 : vector<4xf32> to vector<1x4xf32>
    %331 = vector.broadcast %330 : vector<1x4xf32> to vector<12x4xf32>
    %332 = arith.mulf %0, %331 : vector<12x4xf32>
    %cst_123 = arith.constant dense<0.000000e+00> : vector<12xf32>
    %333 = vector.multi_reduction <add>, %332, %cst_123 [1] : vector<12x4xf32> to vector<12xf32>
    %334 = vector.shape_cast %333 : vector<12xf32> to vector<12x1xf32>
    %335 = arith.subf %322, %334 : vector<12x1xf32>
    %336 = math.exp %335 : vector<12x1xf32>
    %337 = vector.broadcast %336 : vector<12x1xf32> to vector<12x4xf32>
    %338 = arith.mulf %0, %337 : vector<12x4xf32>
    %cst_124 = arith.constant dense<0.000000e+00> : vector<4xf32>
    %339 = vector.multi_reduction <add>, %338, %cst_124 [0] : vector<12x4xf32> to vector<4xf32>
    %340 = vector.shape_cast %339 : vector<4xf32> to vector<1x4xf32>
    %341 = vector.broadcast %340 : vector<1x4xf32> to vector<12x4xf32>
    %342 = arith.mulf %0, %341 : vector<12x4xf32>
    %cst_125 = arith.constant dense<0.000000e+00> : vector<12xf32>
    %343 = vector.multi_reduction <add>, %342, %cst_125 [1] : vector<12x4xf32> to vector<12xf32>
    %344 = vector.shape_cast %343 : vector<12xf32> to vector<12x1xf32>
    %345 = arith.divf %336, %344 : vector<12x1xf32>
    %c0_126 = arith.constant 0 : index
    %c0_127 = arith.constant 0 : index
    %c0_128 = arith.constant 0 : index
    %346 = vector.load %arg2[%c0_126, %c0_127, %c0_128] : memref<1x12x1xf32, #tpu.memory_space<vmem>>, vector<1x12x1xf32>
    %347 = vector.shape_cast %346 : vector<1x12x1xf32> to vector<12x1xf32>
    %348 = arith.addf %322, %347 : vector<12x1xf32>
    %cst_129 = arith.constant 1.000000e-01 : f32
    %349 = vector.broadcast %cst_129 : f32 to vector<12x1xf32>
    %350 = arith.divf %348, %349 : vector<12x1xf32>
    %cst_130 = arith.constant 0.000000e+00 : f32
    %351 = vector.broadcast %cst_130 : f32 to vector<12x4xf32>
    %352 = arith.cmpf ogt, %0, %351 : vector<12x4xf32>
    %cst_131 = arith.constant -1.000000e+30 : f32
    %353 = vector.shape_cast %350 : vector<12x1xf32> to vector<12x1xf32>
    %354 = vector.broadcast %353 : vector<12x1xf32> to vector<12x4xf32>
    %355 = vector.broadcast %cst_131 : f32 to vector<12x4xf32>
    %356 = arith.select %352, %354, %355 : vector<12x4xi1>, vector<12x4xf32>
    %cst_132 = arith.constant dense<0xFF800000> : vector<4xf32>
    %357 = vector.multi_reduction <maximumf>, %356, %cst_132 [0] : vector<12x4xf32> to vector<4xf32>
    %358 = vector.shape_cast %357 : vector<4xf32> to vector<1x4xf32>
    %359 = vector.broadcast %358 : vector<1x4xf32> to vector<12x4xf32>
    %360 = arith.mulf %0, %359 : vector<12x4xf32>
    %cst_133 = arith.constant dense<0.000000e+00> : vector<12xf32>
    %361 = vector.multi_reduction <add>, %360, %cst_133 [1] : vector<12x4xf32> to vector<12xf32>
    %362 = vector.shape_cast %361 : vector<12xf32> to vector<12x1xf32>
    %363 = arith.subf %350, %362 : vector<12x1xf32>
    %364 = math.exp %363 : vector<12x1xf32>
    %365 = vector.broadcast %364 : vector<12x1xf32> to vector<12x4xf32>
    %366 = arith.mulf %0, %365 : vector<12x4xf32>
    %cst_134 = arith.constant dense<0.000000e+00> : vector<4xf32>
    %367 = vector.multi_reduction <add>, %366, %cst_134 [0] : vector<12x4xf32> to vector<4xf32>
    %368 = vector.shape_cast %367 : vector<4xf32> to vector<1x4xf32>
    %369 = vector.broadcast %368 : vector<1x4xf32> to vector<12x4xf32>
    %370 = arith.mulf %0, %369 : vector<12x4xf32>
    %cst_135 = arith.constant dense<0.000000e+00> : vector<12xf32>
    %371 = vector.multi_reduction <add>, %370, %cst_135 [1] : vector<12x4xf32> to vector<12xf32>
    %372 = vector.shape_cast %371 : vector<12xf32> to vector<12x1xf32>
    %373 = arith.divf %364, %372 : vector<12x1xf32>
    %374 = arith.mulf %345, %373 : vector<12x1xf32>
    %375 = vector.broadcast %374 : vector<12x1xf32> to vector<12x32xf32>
    %376 = arith.mulf %26, %375 : vector<12x32xf32>
    %c0_136 = arith.constant 0 : index
    %c0_137 = arith.constant 0 : index
    %377 = vector.load %arg7[%c0_136, %c0_137] : memref<4x12xf32, #tpu.memory_space<vmem>>, vector<4x12xf32>
    %cst_138 = arith.constant dense<0.000000e+00> : vector<4x32xf32>
    %378 = tpu.matmul %377, %376, %cst_138 {dimension_numbers = #tpu.dot_dimension_numbers<[1], [0], [0], [1], [0, 0, 1, 1], [], []>} : vector<4x12xf32>, vector<12x32xf32>, vector<4x32xf32> -> vector<4x32xf32>
    %c0_139 = arith.constant 0 : index
    %c0_140 = arith.constant 0 : index
    %379 = vector.load %arg8[%c0_139, %c0_140] : memref<4x4xbf16, #tpu.memory_space<vmem>>, vector<4x4xbf16>
    %380 = arith.truncf %378 : vector<4x32xf32> to vector<4x32xbf16>
    %cst_141 = arith.constant dense<0.000000e+00> : vector<4x32xf32>
    %381 = tpu.matmul %379, %380, %cst_141 {dimension_numbers = #tpu.dot_dimension_numbers<[1], [0], [0], [1], [0, 0, 1, 1], [], []>} : vector<4x4xbf16>, vector<4x32xbf16>, vector<4x32xf32> -> vector<4x32xf32>
    %382 = arith.truncf %381 : vector<4x32xf32> to vector<4x32xbf16>
    %c0_142 = arith.constant 0 : index
    %c0_143 = arith.constant 0 : index
    %383 = vector.load %arg14[%c0_142, %c0_143] : memref<32x32xbf16, #tpu.memory_space<vmem>>, vector<32x32xbf16>
    %cst_144 = arith.constant dense<0.000000e+00> : vector<4x32xf32>
    %384 = tpu.matmul %382, %383, %cst_144 {dimension_numbers = #tpu.dot_dimension_numbers<[1], [0], [0], [1], [0, 0, 1, 1], [], []>} : vector<4x32xbf16>, vector<32x32xbf16>, vector<4x32xf32> -> vector<4x32xf32>
    %c0_145 = arith.constant 0 : index
    %c0_146 = arith.constant 0 : index
    %385 = vector.load %arg15[%c0_145, %c0_146] : memref<1x32xf32, #tpu.memory_space<vmem>>, vector<1x32xf32>
    %386 = vector.broadcast %385 : vector<1x32xf32> to vector<4x32xf32>
    %387 = arith.addf %384, %386 : vector<4x32xf32>
    %388 = arith.mulf %387, %387 : vector<4x32xf32>
    %389 = arith.mulf %387, %388 : vector<4x32xf32>
    %cst_147 = arith.constant 4.471500e-02 : f32
    %390 = vector.broadcast %cst_147 : f32 to vector<4x32xf32>
    %391 = arith.mulf %390, %389 : vector<4x32xf32>
    %392 = arith.addf %387, %391 : vector<4x32xf32>
    %cst_148 = arith.constant 0.797884583 : f32
    %393 = vector.broadcast %cst_148 : f32 to vector<4x32xf32>
    %394 = arith.mulf %393, %392 : vector<4x32xf32>
    %395 = math.tanh %394 : vector<4x32xf32>
    %cst_149 = arith.constant 1.000000e+00 : f32
    %396 = vector.broadcast %cst_149 : f32 to vector<4x32xf32>
    %397 = arith.addf %396, %395 : vector<4x32xf32>
    %cst_150 = arith.constant 5.000000e-01 : f32
    %398 = vector.broadcast %cst_150 : f32 to vector<4x32xf32>
    %399 = arith.mulf %398, %397 : vector<4x32xf32>
    %400 = arith.mulf %387, %399 : vector<4x32xf32>
    %401 = arith.truncf %400 : vector<4x32xf32> to vector<4x32xbf16>
    %cst_151 = arith.constant dense<0.000000e+00> : vector<4x32xf32>
    %402 = tpu.matmul %379, %401, %cst_151 {dimension_numbers = #tpu.dot_dimension_numbers<[1], [0], [0], [1], [0, 0, 1, 1], [], []>} : vector<4x4xbf16>, vector<4x32xbf16>, vector<4x32xf32> -> vector<4x32xf32>
    %403 = arith.truncf %402 : vector<4x32xf32> to vector<4x32xbf16>
    %c0_152 = arith.constant 0 : index
    %c0_153 = arith.constant 0 : index
    %404 = vector.load %arg16[%c0_152, %c0_153] : memref<32x8xbf16, #tpu.memory_space<vmem>>, vector<32x8xbf16>
    %cst_154 = arith.constant dense<0.000000e+00> : vector<4x8xf32>
    %405 = tpu.matmul %403, %404, %cst_154 {dimension_numbers = #tpu.dot_dimension_numbers<[1], [0], [0], [1], [0, 0, 1, 1], [], []>} : vector<4x32xbf16>, vector<32x8xbf16>, vector<4x8xf32> -> vector<4x8xf32>
    %c0_155 = arith.constant 0 : index
    %c0_156 = arith.constant 0 : index
    %406 = vector.load %arg17[%c0_155, %c0_156] : memref<1x8xf32, #tpu.memory_space<vmem>>, vector<1x8xf32>
    %407 = vector.broadcast %406 : vector<1x8xf32> to vector<4x8xf32>
    %408 = arith.addf %405, %407 : vector<4x8xf32>
    %cst_157 = arith.constant dense<0.000000e+00> : vector<8xf32>
    %409 = vector.multi_reduction <add>, %408, %cst_157 [0] : vector<4x8xf32> to vector<8xf32>
    %410 = vector.shape_cast %409 : vector<8xf32> to vector<1x8xf32>
    %411 = vector.shape_cast %410 : vector<1x8xf32> to vector<1x1x8xf32>
    %c0_158 = arith.constant 0 : index
    %c0_159 = arith.constant 0 : index
    %c0_160 = arith.constant 0 : index
    %412 = vector.load %arg18[%c0_158, %c0_159, %c0_160] : memref<1x1x8xf32, #tpu.memory_space<vmem>>, vector<1x1x8xf32>
    tpu.vector_store %arg18[%c0_158, %c0_159, %c0_160], %411 {strides = array<i32>} : memref<1x1x8xf32, #tpu.memory_space<vmem>>, vector<1x1x8xf32>,
    return
  }
  func.func @transform_0(%arg0: i32) -> (i32, i32, i32) {
    %c0_i32 = arith.constant 0 : i32
    %c0_i32_0 = arith.constant 0 : i32
    %c0_i32_1 = arith.constant 0 : i32
    return %arg0, %c0_i32, %c0_i32_0 : i32, i32, i32
  }
  func.func @transform_1(%arg0: i32) -> (i32, i32, i32) {
    %c0_i32 = arith.constant 0 : i32
    %c0_i32_0 = arith.constant 0 : i32
    %c0_i32_1 = arith.constant 0 : i32
    return %arg0, %c0_i32, %c0_i32_0 : i32, i32, i32
  }
  func.func @transform_2(%arg0: i32) -> (i32, i32) {
    %c0_i32 = arith.constant 0 : i32
    %c0_i32_0 = arith.constant 0 : i32
    %c0_i32_1 = arith.constant 0 : i32
    return %c0_i32, %c0_i32_0 : i32, i32
  }
  func.func @transform_3(%arg0: i32) -> (i32, i32) {
    %c0_i32 = arith.constant 0 : i32
    %c0_i32_0 = arith.constant 0 : i32
    %c0_i32_1 = arith.constant 0 : i32
    return %c0_i32, %c0_i32_0 : i32, i32
  }
  func.func @transform_4(%arg0: i32) -> (i32, i32) {
    %c0_i32 = arith.constant 0 : i32
    %c0_i32_0 = arith.constant 0 : i32
    %c0_i32_1 = arith.constant 0 : i32
    return %c0_i32, %c0_i32_0 : i32, i32
  }
  func.func @transform_5(%arg0: i32) -> (i32, i32) {
    %c0_i32 = arith.constant 0 : i32
    %c0_i32_0 = arith.constant 0 : i32
    %c0_i32_1 = arith.constant 0 : i32
    return %c0_i32, %c0_i32_0 : i32, i32
  }
  func.func @transform_6(%arg0: i32) -> (i32, i32) {
    %c0_i32 = arith.constant 0 : i32
    %c0_i32_0 = arith.constant 0 : i32
    %c0_i32_1 = arith.constant 0 : i32
    return %c0_i32, %c0_i32_0 : i32, i32
  }
  func.func @transform_7(%arg0: i32) -> (i32, i32) {
    %c0_i32 = arith.constant 0 : i32
    %c0_i32_0 = arith.constant 0 : i32
    %c0_i32_1 = arith.constant 0 : i32
    return %c0_i32, %c0_i32_0 : i32, i32
  }
  func.func @transform_8(%arg0: i32) -> (i32, i32, i32) {
    %c0_i32 = arith.constant 0 : i32
    %c0_i32_0 = arith.constant 0 : i32
    %c0_i32_1 = arith.constant 0 : i32
    %c0_i32_2 = arith.constant 0 : i32
    return %c0_i32, %c0_i32_0, %c0_i32_1 : i32, i32, i32
  }
  func.func @transform_9(%arg0: i32) -> (i32, i32) {
    %c0_i32 = arith.constant 0 : i32
    %c0_i32_0 = arith.constant 0 : i32
    %c0_i32_1 = arith.constant 0 : i32
    return %c0_i32, %c0_i32_0 : i32, i32
  }
  func.func @transform_10(%arg0: i32) -> (i32, i32) {
    %c0_i32 = arith.constant 0 : i32
    %c0_i32_0 = arith.constant 0 : i32
    %c0_i32_1 = arith.constant 0 : i32
    return %c0_i32, %c0_i32_0 : i32, i32
  }
  func.func @transform_11(%arg0: i32) -> (i32, i32) {
    %c0_i32 = arith.constant 0 : i32
    %c0_i32_0 = arith.constant 0 : i32
    %c0_i32_1 = arith.constant 0 : i32
    return %c0_i32, %c0_i32_0 : i32, i32
  }
  func.func @transform_12(%arg0: i32) -> (i32, i32) {
    %c0_i32 = arith.constant 0 : i32
    %c0_i32_0 = arith.constant 0 : i32
    %c0_i32_1 = arith.constant 0 : i32
    return %c0_i32, %c0_i32_0 : i32, i32
  }
  func.func @transform_13(%arg0: i32) -> (i32, i32) {
    %c0_i32 = arith.constant 0 : i32
    %c0_i32_0 = arith.constant 0 : i32
    %c0_i32_1 = arith.constant 0 : i32
    return %c0_i32, %c0_i32_0 : i32, i32
  }
  func.func @transform_14(%arg0: i32) -> (i32, i32) {
    %c0_i32 = arith.constant 0 : i32
    %c0_i32_0 = arith.constant 0 : i32
    %c0_i32_1 = arith.constant 0 : i32
    return %c0_i32, %c0_i32_0 : i32, i32
  }
  func.func @transform_15(%arg0: i32) -> (i32, i32) {
    %c0_i32 = arith.constant 0 : i32
    %c0_i32_0 = arith.constant 0 : i32
    %c0_i32_1 = arith.constant 0 : i32
    return %c0_i32, %c0_i32_0 : i32, i32
  }
  func.func @transform_16(%arg0: i32) -> (i32, i32) {
    %c0_i32 = arith.constant 0 : i32
    %c0_i32_0 = arith.constant 0 : i32
    %c0_i32_1 = arith.constant 0 : i32
    return %c0_i32, %c0_i32_0 : i32, i32
  }
  func.func @transform_17(%arg0: i32) -> (i32, i32, i32) {
    %c0_i32 = arith.constant 0 : i32
    %c0_i32_0 = arith.constant 0 : i32
    %c0_i32_1 = arith.constant 0 : i32
    return %arg0, %c0_i32, %c0_i32_0 : i32, i32, i32
  }
}

</mosaic_0001>

<bundles_post_ra>
// kernel: critic_forward.1
= control target key start
LH: loop header
LB: loop body
LE: loop exit
PB: predicated region body
PF: predicated region fallthrough
CT: control target
= control target key end

     0   :  { %s3761_s0 = inlined_call_operand.vmem [shape: f32[2,4,8], index: 0, kind: input, shape index: {}]   ;;  %s3762_s1 = inlined_call_operand.vmem [shape: f32[2,12,1], index: 1, kind: input, shape index: {}]   ;;  %s3763_s2 = inlined_call_operand.vmem [shape: bf16[8,32], index: 2, kind: input, shape index: {}]   ;;  %s3764_s3 = inlined_call_operand.vmem [shape: f32[1,32], index: 3, kind: input, shape index: {}]   ;;  %s3765_s4 = inlined_call_operand.vmem [shape: f32[12,4], index: 4, kind: input, shape index: {}]   ;;  %s3766_s5 = inlined_call_operand.vmem [shape: f32[12,4], index: 5, kind: input, shape index: {}]   ;;  %s3767_s6 = inlined_call_operand.vmem [shape: f32[4,12], index: 6, kind: input, shape index: {}]   ;;  %s3768_s7 = inlined_call_operand.vmem [shape: bf16[4,4], index: 7, kind: input, shape index: {}]   ;;  %s3769_s8 = inlined_call_operand.vmem [shape: bf16[10,32,96], index: 8, kind: input, shape index: {}]   ;;  %s3770_s9 = inlined_call_operand.vmem [shape: f32[8,96], index: 9, kind: input, shape index: {}]   ;;  %s3771_s10 = inlined_call_operand.vmem [shape: f32[1,32], index: 10, kind: input, shape index: {}]   ;;  %s3772_s11 = inlined_call_operand.vmem [shape: f32[1,32], index: 11, kind: input, shape index: {}]   ;;  %s3773_s12 = inlined_call_operand.<no memory space> [shape: f32[1,1], index: 12, kind: input, shape index: {}]   ;;  %s3774_s13 = inlined_call_operand.vmem [shape: bf16[32,32], index: 13, kind: input, shape index: {}]   ;;  %s3775_s14 = inlined_call_operand.vmem [shape: f32[1,32], index: 14, kind: input, shape index: {}]   ;;  %s3776_s15 = inlined_call_operand.vmem [shape: bf16[32,8], index: 15, kind: input, shape index: {}]   ;;  %s3777_s16 = inlined_call_operand.vmem [shape: f32[1,8], index: 16, kind: input, shape index: {}]   ;;  %s3778_s17 = inlined_call_operand.hbm [shape: f32[2,1,8], index: 17, kind: output, shape index: {}]  }
   0x1   :  { %3780 = sst [smem:[#allocation8_spill]] %s3761_s0  ;;  %v22_v0 = vstv %s3773_s12 }
   0x2   :  { %3781 = sst [smem:[#allocation9_spill]] %s3762_s1  ;;  %23 = vst [vmem:[#allocation2] sm:$0x1] %v22_v0 }
   0x3   :  { %3782 = sst [smem:[#allocation10_spill]] %s3763_s2 }
   0x4   :  { %3783 = sst [smem:[#allocation11_spill]] %s3764_s3 }
   0x5   :  { %24 = vsyncpa [#allocation4], 0 }
   0x6   :  { %26 = vsyncpa [#allocation4 + $0x1], 0  ;;  %s3226_s26 = smov 0   ;;  %s3228_s27 = smov 0  }
   0x7   :  { %s3230_s28 = smov 0   ;;  %s3232_s29 = smov 0  }
   0x8 LB: > { %3784 = sst [smem:[#allocation6_spill]] %s3118_s28  ;;  %s3247_s12 = sadd.s32 4294967295, %s3122_s29   ;;  %s3122_s29 = sphi %s3232_s29, %s3797_s29   ;;  %s3118_s28 = sphi %s3230_s28, %s3796_s28   ;;  %s3114_s27 = sphi %s3228_s27, %s3795_s27   ;;  %s3110_s26 = sphi %s3226_s26, %s3794_s26  }
   0x9   : > { %s2541_s0 = sadd.s32 4294967294, %s3122_s29   ;;  %s3251_s30 = sadd.s32 1, %s3122_s29  }
   0xa   : > { %s406_s18 = sadd.s32 1, %s3118_s28  ;;  %s403_s19 = ssub.s32 %s3122_s29, %s3251_s30 }
   0xb   : > { %p416_p0 = scmp.ne.s32.totalorder %s3118_s28, %s3114_s27  ;;  %p404_p1 = scmp.eq.s32.totalorder %s403_s19, 0 }
   0xc   : > { %p417_p2 = scmp.eq.s32.totalorder %s3247_s12, 1  ;;  %p422_p3 = scmp.ne.s32.totalorder %s3114_s27, %s3110_s26 }
   0xd   : > { %p423_p4 = scmp.eq.s32.totalorder %s2541_s0, 1  ;;  %p2544_p7 = scmp.ge.s32.totalorder %s3122_s29, 1 }
   0xe   : > { %s3262_s1 = scalar_select %p404_p1, %s3118_s28, %s406_s18  }
   0xf   : > { %p3264_p5 = por %p417_p2, %p416_p0  ;;  %p3268_p6 = por %p423_p4, %p422_p3 }
  0x10   : > { %3785 = sst [smem:[#allocation7_spill]] %s3262_s1  ;;  %p501_p8 = scmp.lt.s32.totalorder %s3122_s29, 3 }
  0x12   : > { %p502_p9 = pnand %p2544_p7, %p501_p8 }
  0x13   : > { %s3788_s2 = sld [smem:[#allocation10_spill]] (!%p502_p9)  ;;  %vm584_vm0 = vcmask (!%p502_p9), 1043456   ;;  %p556_p10 = scmp.lt.s32.totalorder (!%p502_p9), %s3247_s12, 1  ;;  %v3124_v2 = vmov (!%p502_p9), 0.0   ;;  %vm3125_vm1 = vmmov (!%p502_p9), 0   ;;  %vm580_vm2 = vcmask (!%p502_p9), 64512  }
  0x14   : > { %505 = sbr.rel (%p502_p9) target bundleno = 5202 (0x1452), region = 88  ;;  %2720 = vmatprep.subr.bf16.mxu0 (!%p502_p9), %v3124_v2  ;;  %2722 = vmatprep.mubr.msk.bf16.mxu0 (!%p502_p9), %vm3125_vm1, %v3124_v2  ;;  %s3789_s19 = sld [smem:[#allocation8_spill]] (!%p502_p9)  ;;  %v568_v6 = vld [vmem:[%s3766_s5] sm:$0xff] (!%p502_p9)  ;;  %vm638_vm3 = vcmask (!%p502_p9), 31744   ;;  %v569_v24 = vld [vmem:[%s3766_s5 + $0x8] sm:$0xf] (!%p502_p9) }
  0x15   : > { %2728 = vmatprep.mubr.msk.f32.mxu1 (!%p502_p9), %vm638_vm3, %v568_v6  ;;  %v2928_v7 = vld [vmem:[%s3769_s8] sm:$0xff] (!%p502_p9)   ;;  %s3790_s3 = sld [smem:[#allocation11_spill]] (!%p502_p9)  ;;  %v567_v26 = vld [vmem:[%s3765_s4 + $0x8] sm:$0xf] (!%p502_p9)  ;;  %s3126_s28 = smov (!%p502_p9), 64   ;;  %vm827_vm4 = vcmask (!%p502_p9), 261120  }
  0x16   : > { %v566_v25 = vld [vmem:[%s3765_s4] sm:$0xff] (!%p502_p9)  ;;  %v2929_v27 = vld [vmem:[%s3769_s8 + $0x8] sm:$0xff] (!%p502_p9)   ;;  %s3127_s0 = smov (!%p502_p9), 96   ;;  %vm1946_vm5 = vcmask (!%p502_p9), 257024   ;;  %vm1992_vm8 = vcmask (!%p502_p9), 27648   ;;  %vm3131_vm9 = vmmov (!%p502_p9), 1  }
  0x17   : > { %v3331_v28 = vld [vmem:[%s3770_s9 + $0x3] ss:$0 sm:$0xff] (!%p502_p9)  ;;  %v3338_v29 = vld [vmem:[%s3770_s9 + $0x1] ss:$0 sm:$0xff] (!%p502_p9)  ;;  %v3364_v37 = vld [vmem:[%s3769_s8 + $0x28] sm:$0xff] (!%p502_p9)   ;;  %vm2138_vm11 = vcmask (!%p502_p9), 97280  }
  0x18   : > { %1165 = vrot.lane.b32.xlu0 (!%p502_p9), %v3331_v28, %s3126_s28  ;;  %v3353_v35 = vld [vmem:[%s3769_s8 + $0x20] sm:$0xff] (!%p502_p9)   ;;  %vm2877_vm10 = vmpackc.low (!%p502_p9), %vm584_vm0, %vm3131_vm9  ;;  %vm2220_vm12 = vcmask (!%p502_p9), 1041408   ;;  %vm2451_vm13 = vcmask (!%p502_p9), 60416   ;;  %vm2459_vm14 = vcmask (!%p502_p9), 57344  }
  0x19   : > { %v572_v1 = vld [vmem:[%s3788_s2] sm:$0xf] (!%p502_p9)  ;;  %s3128_s2 = smov (!%p502_p9), 32  }
  0x1a   : > { %v586_v3 = vsel (!%p502_p9), %vm584_vm0, %v572_v1, 0  ;;  %v2556_v38 = vld [vmem:[%s3770_s9] ss:$0 sm:$0xff] (!%p502_p9)  ;;  %v3386_v54 = vld [vmem:[%s3770_s9 + $0x2] ss:$0 sm:$0xff] (!%p502_p9) }
  0x1b   : > { %2721 = vmatpush3.bf16.msra.mxu0 %v586_v3  ;;  %s3283_s24 = scalar_select %p556_p10, %s3247_s12, 1  ;;  %v2548_v8 = vld [vmem:[%s3790_s3] ss:$0 sm:$0xff] }
  0x1c   : > { %2736 = vmatprep.subr.bf16.mxu0 %v3124_v2  ;;  %892 = vrot.lane.b32.xlu0 %v3338_v29, %s3126_s28 }
  0x1d   : > { %s2545_s25 = sshll.u32 %s3283_s24, 2 }
  0x1e   : > { %s559_s22 = scalar_lea.vmem %s3789_s19, %s2545_s25  ;;  %s3791_s19 = sld [smem:[#allocation9_spill]] }
  0x1f   : > { %v570_v4 = vld [vmem:[%s559_s22] sm:$0xf]  ;;  %s2656_s22 = sshll.u32 %s3247_s12, 4  ;;  %s3132_s12 = smov [#allocation3]  }
  0x20   : > { %v571_v5 = vpack.c.bf16 %v570_v4, %v570_v4  ;;  %s3719_s1 = scalar_lea.hbm %s3778_s17, %s2656_s22 }
  0x22   : > { %2723 = vmatmul.mubr.msk.bf16.vlgmr.msra.gmra.mrb[0].mxu0 %vm580_vm2, %v571_v5 }
  0x23   : > { %2740 = vmatprep.mubr.msk.bf16.mxu0 %vm3125_vm1, %v3124_v2  ;;  %2737 = vmatpush3.bf16.msra.mxu0 %v2928_v7 }
  0x24   : > { %2738 = vmatprep.subr.bf16.mxu0 %v3124_v2 }
  0x27   : > { %2739 = vmatpush3.bf16.msra.mxu0 %v2929_v27 }
  0x28   : > { %2752 = vmatprep.subr.bf16.mxu0 %v3124_v2 }
  0x8a   : > { %v1166_v5 = vpop.permute.xlu0 %1165 }
  0xf5   : > { %v622_v9 = vpop.f32.mrb[0].mxu0 }
  0xf6   : > { %v623_v10 = vadd.f32 %v2548_v8, %v622_v9  ;;  %v2724_v11 = vpop.f32.mrb[1].mxu0 }
  0xf7   : > { %v625_v12 = vpop.f32.mrb[2].mxu0 }
  0xf8   : > { %v628_v13 = vmul.f32 0.999995, %v623_v10  ;;  %v2725_v14 = vpop.f32.mrb[3].mxu0 }
  0xfa   : > { %v629_v15 = vmul.f32 %v628_v13, %v628_v13 }
  0xfc   : > { %v630_v16 = vmul.f32 %v629_v15, %v628_v13 }
  0xfe   : > { %v631_v17 = vmul.f32 0.044715, %v630_v16 }
 0x100   : > { %v632_v18 = vadd.f32 %v631_v17, %v628_v13 }
 0x102   : > { %v633_v19 = vmul.f32 0.7978846, %v632_v18 }
 0x104   : > { %2950 = vtanh.f32 %v633_v19 }
 0x10e   : > { %v2951_v20 = vpop.eup %2950 }
 0x10f   : > { %v635_v21 = vadd.f32 1.0, %v2951_v20 }
 0x111   : > { %v636_v22 = vmul.f32 0.5, %v635_v21 }
 0x113   : > { %v637_v23 = vmul.f32 %v636_v22, %v628_v13 }
 0x115   : > { %2726 = vmatprep.subr.msk.mxu1 %vm584_vm0, %v637_v23 }
 0x116   : > { %2727 = vmatpush3.msk.msra.mxu1 %vm584_vm0, %v637_v23 }
 0x117   : > { %2729 = vmatmul.mubr.msk.f32.vlgmr.msra.gmra.mrb[0].mxu1 %vm638_vm3, %v569_v24  ;;  %2731 = vmatprep.subr.msk.mxu1 %vm584_vm0, %v637_v23 }
 0x118   : > { %2732 = vmatpush3.msk.msra.mxu1 %vm584_vm0, %v637_v23  ;;  %2733 = vmatprep.mubr.msk.f32.mxu1 %vm638_vm3, %v566_v25 }
 0x119   : > { %2744 = vmatprep.subr.bf16.mxu1 %v3124_v2 }
 0x11b   : > { %2734 = vmatmul.mubr.msk.f32.vlgmr.msra.gmra.mrb[2].mxu1 %vm638_vm3, %v567_v26 }
 0x11c   : > { %2745 = vmatpush3.bf16.msra.mxu1 %v2928_v7  ;;  %2748 = vmatprep.mubr.msk.bf16.mxu1 %vm3125_vm1, %v3124_v2  ;;  %v893_v7 = vpop.permute.xlu0 %892 }
 0x11d   : > { %2746 = vmatprep.subr.bf16.mxu1 %v3124_v2 }
 0x120   : > { %2747 = vmatpush3.bf16.msra.mxu1 %v2929_v27 }
 0x121   : > { %2760 = vmatprep.subr.bf16.mxu1 %v3124_v2 }
 0x1ea   : > { %v2730_v30 = vpop.f32.mrb[0].mxu1 }
 0x1eb   : > { %v714_v31 = vpop.f32.mrb[1].mxu1 }
 0x1ec   : > { %v3342_v32 = vpack.c.bf16 %v2730_v30, %v714_v31 }
 0x1ee   : > { %v3344_v33 = vpop.f32.mrb[2].mxu1  ;;  %2741 = vmatmul.mubr.msk.bf16.vlgmr.msra.gmra.mrb[4].mxu0 %vm827_vm4, %v3342_v32 }
 0x1ef   : > { %v3348_v34 = vpop.f32.mrb[3].mxu1  ;;  %2756 = vmatprep.mubr.msk.bf16.mxu0 %vm3125_vm1, %v3124_v2 }
 0x1f0   : > { %v805_v36 = vpack.c.bf16 %v3344_v33, %v3348_v34 }
 0x1f2   : > { %2749 = vmatmul.mubr.msk.bf16.vlgmr.msra.gmra.mrb[4].mxu1 %vm827_vm4, %v805_v36 }
 0x1f3   : > { %2761 = vmatpush3.bf16.msra.mxu1 %v3353_v35  ;;  %2764 = vmatprep.mubr.msk.bf16.mxu1 %vm3125_vm1, %v3124_v2 }
 0x1f4   : > { %2762 = vmatprep.subr.bf16.mxu1 %v3124_v2 }
 0x1f7   : > { %2763 = vmatpush3.bf16.msra.mxu1 %v3364_v37 }
 0x1f8   : > { %2776 = vmatprep.subr.bf16.mxu1 %v3124_v2 }
 0x1fa   : > { %2765 = vmatmul.mubr.msk.bf16.vlgmr.msra.gmra.mrb[8].mxu1 %vm827_vm4, %v805_v36  ;;  %v2932_v36 = vld [vmem:[%s3769_s8 + $0x30] sm:$0xff]  }
 0x1fb   : > { %2780 = vmatprep.mubr.msk.bf16.mxu1 %vm3125_vm1, %v3124_v2  ;;  %2777 = vmatpush3.bf16.msra.mxu1 %v2932_v36 }
 0x1fc   : > { %2778 = vmatprep.subr.bf16.mxu1 %v3124_v2 }
 0x2c1   : > { %v865_v39 = vpop.f32.mrb[4].mxu0 }
 0x2c2   : > { %v866_v40 = vadd.f32 %v2556_v38, %v865_v39  ;;  %v2742_v41 = vpop.f32.mrb[5].mxu0  ;;  %v2934_v39 = vld [vmem:[%s3769_s8 + $0x38] sm:$0xff]  }
 0x2c3   : > { %v868_v42 = vpop.f32.mrb[6].mxu0  ;;  %2779 = vmatpush3.bf16.msra.mxu1 %v2934_v39 }
 0x2c4   : > { %v877_v43 = vadd.f32 %v3338_v29, %v866_v40  ;;  %v2743_v44 = vpop.f32.mrb[7].mxu0  ;;  %v869_v49 = vadd.f32 %v2556_v38, %v868_v42  ;;  %2792 = vmatprep.subr.bf16.mxu1 %v3124_v2 }
 0x2c5   : > { %v958_v45 = vpop.f32.mrb[4].mxu1 }
 0x2c6   : > { %v2561_v46 = vmul.f32 -1.442695, %v877_v43  ;;  %v3378_v47 = vadd.f32 %v2556_v38, %v958_v45  ;;  %v2750_v48 = vpop.f32.mrb[5].mxu1  ;;  %v878_v53 = vadd.f32 %v3338_v29, %v869_v49  ;;  %v2935_v43 = vld [vmem:[%s3769_s8 + $0x18] sm:$0xff]  }
 0x2c7   : > { %v961_v50 = vpop.f32.mrb[6].mxu1 }
 0x2c8   : > { %2952 = vpow2.f32 %v2561_v46  ;;  %v3380_v51 = vadd.f32 %v2556_v38, %v961_v50  ;;  %v2751_v52 = vpop.f32.mrb[7].mxu1  ;;  %v2562_v58 = vmul.f32 -1.442695, %v878_v53  ;;  %v2933_v38 = vld [vmem:[%s3769_s8 + $0x10] sm:$0xff]  }
 0x2c9   : > { %2753 = vmatpush3.bf16.msra.mxu0 %v2933_v38 }
 0x2ca   : > { %2954 = vpow2.f32 %v2562_v58  ;;  %2754 = vmatprep.subr.bf16.mxu0 %v3124_v2 }
 0x2cd   : > { %v1138_v55 = vpop.f32.mrb[8].mxu1  ;;  %2755 = vmatpush3.bf16.msra.mxu0 %v2935_v43 }
 0x2ce   : > { %v1139_v56 = vadd.f32 %v3386_v54, %v1138_v55  ;;  %v2766_v57 = vpop.f32.mrb[9].mxu1  ;;  %2768 = vmatprep.subr.bf16.mxu0 %v3124_v2 }
 0x2cf   : > { %v1141_v59 = vpop.f32.mrb[10].mxu1 }
 0x2d0   : > { %v1150_v60 = vadd.f32 %v3331_v28, %v1139_v56  ;;  %v1142_v61 = vadd.f32 %v3386_v54, %v1141_v59  ;;  %v2767_v62 = vpop.f32.mrb[11].mxu1 }
 0x2d2   : > { %v2953_v63 = vpop.eup %2952  ;;  %v2582_v0 = vmul.f32 -1.442695, %v1150_v60  ;;  %v1151_v1 = vadd.f32 %v3331_v28, %v1142_v61 }
 0x2d3   : > { %v885_v3 = vadd.f32 1.0, %v2953_v63  ;;  %v2937_v63 = vld [vmem:[%s3769_s8 + $0x48] sm:$0xff]  }
 0x2d4   : > { %2956 = vpow2.f32 %v2582_v0  ;;  %v2583_v4 = vmul.f32 -1.442695, %v1151_v1  ;;  %v2955_v6 = vpop.eup %2954 }
 0x2d5   : > { %2958 = vrcp.f32 %v885_v3  ;;  %v886_v14 = vadd.f32 1.0, %v2955_v6 }
 0x2d6   : > { %2960 = vpow2.f32 %v2583_v4 }
 0x2de   : > { %v2957_v8 = vpop.eup %2956 }
 0x2df   : > { %v3392_v9 = vpop.eup %2958  ;;  %v1158_v10 = vadd.f32 1.0, %v2957_v8 }
 0x2e0   : > { %v2961_v11 = vpop.eup %2960  ;;  %v895_v12 = vmul.f32 %v3392_v9, %v893_v7  ;;  %v909_v53 = vsub.f32 1.0, %v3392_v9 }
 0x2e1   : > { %2962 = vrcp.f32 %v1158_v10  ;;  %v1159_v13 = vadd.f32 1.0, %v2961_v11 }
 0x2e2   : > { %899 = vrot.lane.b32.xlu0 %v895_v12, %s3126_s28 }
 0x2e3   : > { %2964 = vrcp.f32 %v1159_v13 }
 0x2e4   : > { %2966 = vrcp.f32 %v886_v14 }
 0x2eb   : > { %v2963_v15 = vpop.eup %2962 }
 0x2ec   : > { %v1168_v16 = vmul.f32 %v2963_v15, %v1166_v5  ;;  %v1182_v45 = vsub.f32 1.0, %v2963_v15 }
 0x2ed   : > { %v2965_v17 = vpop.eup %2964 }
 0x2ee   : > { %1172 = vrot.lane.b32.xlu1 %v1168_v16, %s3126_s28  ;;  %v1169_v18 = vmul.f32 %v2965_v17, %v1166_v5  ;;  %v2967_v19 = vpop.eup %2966  ;;  %v1183_v46 = vsub.f32 1.0, %v2965_v17 }
 0x2ef   : > { %v896_v20 = vmul.f32 %v2967_v19, %v893_v7 }
 0x2f2   : > { %1174 = vrot.lane.b32.xlu1 %v1169_v18, %s3126_s28 }
 0x2f6   : > { %901 = vrot.lane.b32.xlu1 %v896_v20, %s3126_s28 }
 0x354   : > { %v900_v21 = vpop.permute.xlu0 %899 }
 0x355   : > { %v905_v24 = vadd.f32 %v900_v21, %v866_v40 }
 0x360   : > { %v1173_v22 = vpop.permute.xlu1 %1172 }
 0x361   : > { %v1178_v23 = vadd.f32 %v1173_v22, %v1139_v56  ;;  %v910_v56 = vsub.f32 1.0, %v2967_v19 }
 0x363   : > { %2968 = vtanh.f32 %v1178_v23 }
 0x364   : > { %v1175_v25 = vpop.permute.xlu1 %1174  ;;  %2970 = vtanh.f32 %v905_v24 }
 0x365   : > { %v1179_v26 = vadd.f32 %v1175_v25, %v1142_v61  ;;  %v2936_v61 = vld [vmem:[%s3769_s8 + $0x40] sm:$0xff]  }
 0x367   : > { %2972 = vtanh.f32 %v1179_v26 }
 0x368   : > { %v902_v27 = vpop.permute.xlu1 %901 }
 0x369   : > { %v906_v30 = vadd.f32 %v902_v27, %v869_v49 }
 0x36b   : > { %2974 = vtanh.f32 %v906_v30 }
 0x36d   : > { %v2969_v31 = vpop.eup %2968 }
 0x36e   : > { %1186 = vrot.lane.b32.xlu0 %v2969_v31, %s3127_s0  ;;  %v2971_v40 = vpop.eup %2970 }
 0x371   : > { %v2973_v41 = vpop.eup %2972 }
 0x372   : > { %913 = vrot.lane.b32.xlu0 %v2971_v40, %s3127_s0  ;;  %1188 = vrot.lane.b32.xlu1 %v2973_v41, %s3127_s0 }
 0x375   : > { %v2975_v42 = vpop.eup %2974 }
 0x376   : > { %915 = vrot.lane.b32.xlu1 %v2975_v42, %s3127_s0 }
 0x3e0   : > { %v1187_v44 = vpop.permute.xlu0 %1186 }
 0x3e1   : > { %v3419_v49 = vmul.f32 %v1187_v44, %v1182_v45 }
 0x3e4   : > { %v1189_v48 = vpop.permute.xlu1 %1188  ;;  %v914_v52 = vpop.permute.xlu0 %913 }
 0x3e5   : > { %v3421_v50 = vmul.f32 %v1189_v48, %v1183_v46  ;;  %v3426_v58 = vmul.f32 %v914_v52, %v909_v53 }
 0x3e7   : > { %v1235_v55 = vpack.c.bf16 %v3421_v50, %v3419_v49 }
 0x3e8   : > { %v916_v57 = vpop.permute.xlu1 %915 }
 0x3e9   : > { %v3428_v59 = vmul.f32 %v916_v57, %v910_v56  ;;  %1242 = vrot.lane.b32.xlu0 %v1235_v55, %s3127_s0 }
 0x3eb   : > { %v965_v60 = vpack.c.bf16 %v3428_v59, %v3426_v58 }
 0x3ed   : > { %972 = vrot.lane.b32.xlu1 %v965_v60, %s3127_s0 }
 0x45b   : > { %v3437_v62 = vpop.permute.xlu0 %1242 }
 0x45c   : > { %2781 = vmatmul.mubr.msk.bf16.vlgmr.msra.gmra.mrb[12].mxu1 %vm827_vm4, %v3437_v62 }
 0x45d   : > { %2793 = vmatpush3.bf16.msra.mxu1 %v2936_v61  ;;  %2796 = vmatprep.mubr.msk.bf16.mxu1 %vm3125_vm1, %v3124_v2 }
 0x45e   : > { %2794 = vmatprep.subr.bf16.mxu1 %v3124_v2 }
 0x45f   : > { %v3447_v0 = vpop.permute.xlu1 %972 }
 0x460   : > { %2757 = vmatmul.mubr.msk.bf16.vlgmr.msra.gmra.mrb[8].mxu0 %vm827_vm4, %v3447_v0 }
 0x461   : > { %2769 = vmatpush3.bf16.msra.mxu0 %v3353_v35  ;;  %2795 = vmatpush3.bf16.msra.mxu1 %v2937_v63 }
 0x462   : > { %2770 = vmatprep.subr.bf16.mxu0 %v3124_v2  ;;  %2772 = vmatprep.mubr.msk.bf16.mxu0 %vm3125_vm1, %v3124_v2 }
 0x463   : > { %2808 = vmatprep.subr.bf16.mxu1 %v3124_v2 }
 0x464   : > { %2797 = vmatmul.mubr.msk.bf16.vlgmr.msra.gmra.mrb[16].mxu1 %vm827_vm4, %v3447_v0 }
 0x465   : > { %2771 = vmatpush3.bf16.msra.mxu0 %v3364_v37  ;;  %2812 = vmatprep.mubr.msk.bf16.mxu1 %vm3125_vm1, %v3124_v2 }
 0x466   : > { %2784 = vmatprep.subr.bf16.mxu0 %v3124_v2 }
 0x468   : > { %2773 = vmatmul.mubr.msk.bf16.vlgmr.msra.gmra.mrb[12].mxu0 %vm827_vm4, %v3342_v32 }
 0x469   : > { %2788 = vmatprep.mubr.msk.bf16.mxu0 %vm3125_vm1, %v3124_v2 }
 0x52f   : > { %v1293_v35 = vpop.f32.mrb[12].mxu1 }
 0x530   : > { %v1294_v1 = vadd.f32 %v3331_v28, %v1293_v35  ;;  %v2782_v3 = vpop.f32.mrb[13].mxu1 }
 0x531   : > { %v1296_v4 = vpop.f32.mrb[14].mxu1 }
 0x532   : > { %v1297_v5 = vadd.f32 %v3331_v28, %v1296_v4  ;;  %1316 = vrot.lane.b32.xlu0 %v1294_v1, %s3126_s28  ;;  %v2783_v37 = vpop.f32.mrb[15].mxu1 }
 0x533   : > { %v1023_v6 = vpop.f32.mrb[8].mxu0 }
 0x534   : > { %v1024_v7 = vadd.f32 %v3338_v29, %v1023_v6  ;;  %1318 = vrot.lane.b32.xlu1 %v1297_v5, %s3126_s28  ;;  %v2758_v8 = vpop.f32.mrb[9].mxu0  ;;  %v2938_v6 = vld [vmem:[%s3769_s8 + $0x50] sm:$0xff]  }
 0x535   : > { %v1026_v32 = vpop.f32.mrb[10].mxu0  ;;  %2785 = vmatpush3.bf16.msra.mxu0 %v2938_v6 }
 0x536   : > { %v1027_v9 = vadd.f32 %v3338_v29, %v1026_v32  ;;  %1046 = vrot.lane.b32.xlu0 %v1024_v7, %s3126_s28  ;;  %v2759_v10 = vpop.f32.mrb[11].mxu0  ;;  %v1030_v21 = vadd.f32 %v1024_v7, %v3378_v47  ;;  %v2940_v7 = vld [vmem:[%s3769_s8 + $0x70] sm:$0xff]   ;;  %2786 = vmatprep.subr.bf16.mxu0 %v3124_v2 }
 0x537   : > { %v3473_v11 = vpop.f32.mrb[16].mxu1  ;;  %2809 = vmatpush3.bf16.msra.mxu1 %v2940_v7 }
 0x538   : > { %v2798_v12 = vpop.f32.mrb[17].mxu1  ;;  %1048 = vrot.lane.b32.xlu1 %v1027_v9, %s3126_s28  ;;  %v1031_v23 = vadd.f32 %v1027_v9, %v3380_v51  ;;  %v2571_v25 = vmul.f32 -1.442695, %v1030_v21  ;;  %2810 = vmatprep.subr.bf16.mxu1 %v3124_v2  ;;  %v2942_v9 = vld [vmem:[%s3769_s8 + $0x78] sm:$0xff]  }
 0x539   : > { %v3476_v28 = vpop.f32.mrb[18].mxu1 }
 0x53a   : > { %v2799_v13 = vpop.f32.mrb[19].mxu1  ;;  %v2572_v26 = vmul.f32 -1.442695, %v1031_v23 }
 0x53b   : > { %v1228_v14 = vpop.f32.mrb[12].mxu0  ;;  %2811 = vmatpush3.bf16.msra.mxu1 %v2942_v9 }
 0x53c   : > { %v2774_v15 = vpop.f32.mrb[13].mxu0  ;;  %v1229_v18 = vadd.f32 %v3386_v54, %v1228_v14  ;;  %2824 = vmatprep.subr.bf16.mxu1 %v3124_v2 }
 0x53d   : > { %v1231_v16 = vpop.f32.mrb[14].mxu0 }
 0x53e   : > { %v2775_v17 = vpop.f32.mrb[15].mxu0  ;;  %v1232_v19 = vadd.f32 %v3386_v54, %v1231_v16  ;;  %v1300_v29 = vadd.f32 %v1294_v1, %v1229_v18 }
 0x540   : > { %v1301_v20 = vadd.f32 %v1297_v5, %v1232_v19  ;;  %v2592_v22 = vmul.f32 -1.442695, %v1300_v29 }
 0x542   : > { %v2593_v24 = vmul.f32 -1.442695, %v1301_v20  ;;  %2976 = vpow2.f32 %v2592_v22 }
 0x544   : > { %2978 = vpow2.f32 %v2593_v24 }
 0x545   : > { %2980 = vpow2.f32 %v2571_v25 }
 0x546   : > { %2982 = vpow2.f32 %v2572_v26 }
 0x54c   : > { %v2977_v27 = vpop.eup %2976 }
 0x54d   : > { %v1308_v31 = vadd.f32 1.0, %v2977_v27 }
 0x54e   : > { %v2979_v30 = vpop.eup %2978 }
 0x54f   : > { %v2981_v36 = vpop.eup %2980  ;;  %v1309_v38 = vadd.f32 1.0, %v2979_v30  ;;  %2984 = vrcp.f32 %v1308_v31 }
 0x550   : > { %v2983_v54 = vpop.eup %2982  ;;  %v1038_v39 = vadd.f32 1.0, %v2981_v36 }
 0x551   : > { %v1039_v40 = vadd.f32 1.0, %v2983_v54  ;;  %2986 = vrcp.f32 %v1309_v38  ;;  %v2943_v38 = vld [vmem:[%s3769_s8 + $0x88] sm:$0xff]  }
 0x552   : > { %2988 = vrcp.f32 %v1038_v39 }
 0x553   : > { %2990 = vrcp.f32 %v1039_v40 }
 0x559   : > { %v2985_v41 = vpop.eup %2984 }
 0x55a   : > { %v1336_v10 = vsub.f32 1.0, %v2985_v41  ;;  %v1348_v16 = vmul.f32 %v2985_v41, %v3419_v49 }
 0x55b   : > { %v2987_v44 = vpop.eup %2986 }
 0x55c   : > { %v2989_v48 = vpop.eup %2988  ;;  %v1337_v14 = vsub.f32 1.0, %v2987_v44  ;;  %v1349_v17 = vmul.f32 %v2987_v44, %v3421_v50  ;;  %v3516_v50 = vld [vmem:[%s3770_s9 + $0x7] ss:$0 sm:$0xff] }
 0x55d   : > { %v2991_v55 = vpop.eup %2990  ;;  %v1078_v25 = vmul.f32 %v2989_v48, %v3426_v58  ;;  %v2941_v58 = vld [vmem:[%s3769_s8 + $0x80] sm:$0xff]  }
 0x55e   : > { %v1067_v23 = vsub.f32 1.0, %v2991_v55  ;;  %v1079_v26 = vmul.f32 %v2991_v55, %v3428_v59 }
 0x5a4   : > { %v1317_v42 = vpop.permute.xlu0 %1316 }
 0x5a5   : > { %v1322_v43 = vmul.f32 %v2985_v41, %v1317_v42 }
 0x5a6   : > { %v1319_v45 = vpop.permute.xlu1 %1318 }
 0x5a7   : > { %v1323_v46 = vmul.f32 %v2987_v44, %v1319_v45  ;;  %1326 = vrot.lane.b32.xlu0 %v1322_v43, %s3126_s28 }
 0x5a8   : > { %v1047_v52 = vpop.permute.xlu0 %1046 }
 0x5a9   : > { %v1052_v53 = vmul.f32 %v2989_v48, %v1047_v52  ;;  %1328 = vrot.lane.b32.xlu1 %v1323_v46, %s3126_s28  ;;  %v2626_v52 = vld [vmem:[%s3770_s9 + $0x6] ss:$0 sm:$0xff] }
 0x5aa   : > { %v1049_v56 = vpop.permute.xlu1 %1048 }
 0x5ab   : > { %v1053_v57 = vmul.f32 %v2991_v55, %v1049_v56  ;;  %1056 = vrot.lane.b32.xlu0 %v1052_v53, %s3126_s28 }
 0x5ad   : > { %1058 = vrot.lane.b32.xlu1 %v1053_v57, %s3126_s28 }
 0x619   : > { %v1327_v60 = vpop.permute.xlu0 %1326 }
 0x61a   : > { %v1332_v61 = vadd.f32 %v1327_v60, %v1229_v18 }
 0x61b   : > { %v1329_v63 = vpop.permute.xlu1 %1328 }
 0x61c   : > { %2992 = vtanh.f32 %v1332_v61  ;;  %v1333_v35 = vadd.f32 %v1329_v63, %v1232_v19  ;;  %v1066_v19 = vsub.f32 1.0, %v2989_v48 }
 0x61d   : > { %v1057_v1 = vpop.permute.xlu0 %1056 }
 0x61e   : > { %2994 = vtanh.f32 %v1333_v35  ;;  %v1062_v3 = vadd.f32 %v1057_v1, %v3378_v47  ;;  %v2939_v47 = vld [vmem:[%s3769_s8 + $0x58] sm:$0xff]  }
 0x61f   : > { %v1059_v4 = vpop.permute.xlu1 %1058  ;;  %2787 = vmatpush3.bf16.msra.mxu0 %v2939_v47 }
 0x620   : > { %2996 = vtanh.f32 %v1062_v3  ;;  %v1063_v5 = vadd.f32 %v1059_v4, %v3380_v51  ;;  %2800 = vmatprep.subr.bf16.mxu0 %v3124_v2 }
 0x622   : > { %2998 = vtanh.f32 %v1063_v5 }
 0x626   : > { %v2993_v37 = vpop.eup %2992 }
 0x627   : > { %1340 = vrot.lane.b32.xlu0 %v2993_v37, %s3127_s0 }
 0x628   : > { %v2995_v8 = vpop.eup %2994 }
 0x629   : > { %1342 = vrot.lane.b32.xlu1 %v2995_v8, %s3127_s0 }
 0x62a   : > { %v2997_v51 = vpop.eup %2996 }
 0x62b   : > { %1070 = vrot.lane.b32.xlu0 %v2997_v51, %s3127_s0 }
 0x62c   : > { %v2999_v32 = vpop.eup %2998 }
 0x62d   : > { %1072 = vrot.lane.b32.xlu1 %v2999_v32, %s3127_s0 }
 0x699   : > { %v1341_v12 = vpop.permute.xlu0 %1340 }
 0x69a   : > { %v1346_v13 = vmul.f32 %v1341_v12, %v1336_v10 }
 0x69b   : > { %v1343_v15 = vpop.permute.xlu1 %1342 }
 0x69c   : > { %v1347_v18 = vmul.f32 %v1343_v15, %v1337_v14  ;;  %v1350_v20 = vadd.f32 %v1348_v16, %v1346_v13 }
 0x69d   : > { %v1071_v29 = vpop.permute.xlu0 %1070 }
 0x69e   : > { %v1351_v21 = vadd.f32 %v1349_v17, %v1347_v18  ;;  %v1076_v22 = vmul.f32 %v1071_v29, %v1066_v19 }
 0x69f   : > { %v1073_v24 = vpop.permute.xlu1 %1072 }
 0x6a0   : > { %v1077_v27 = vmul.f32 %v1073_v24, %v1067_v23  ;;  %v1353_v30 = vpack.c.bf16 %v1351_v21, %v1350_v20  ;;  %v1080_v31 = vadd.f32 %v1078_v25, %v1076_v22  ;;  %v2944_v24 = vld [vmem:[%s3769_s8 + $0x90] sm:$0xff]   ;;  %v2945_v25 = vld [vmem:[%s3769_s8 + $0x98] sm:$0xff]  }
 0x6a2   : > { %v1081_v36 = vadd.f32 %v1079_v26, %v1077_v27  ;;  %1365 = vrot.lane.b32.xlu0 %v1353_v30, %s3127_s0 }
 0x6a4   : > { %v1352_v49 = vpack.c.bf16 %v1081_v36, %v1080_v31 }
 0x6a6   : > { %1596 = vrot.lane.b32.xlu1 %v1352_v49, %s3127_s0  ;;  %1681 = vrot.lane.b32.xlu0 %v3516_v50, %s3126_s28 }
 0x714   : > { %v1366_v59 = vpop.permute.xlu0 %1365 }
 0x715   : > { %2789 = vmatmul.mubr.msk.bf16.vlgmr.msra.gmra.mrb[16].mxu0 %vm827_vm4, %v1366_v59 }
 0x716   : > { %2801 = vmatpush3.bf16.msra.mxu0 %v2941_v58  ;;  %2804 = vmatprep.mubr.msk.bf16.mxu0 %vm3125_vm1, %v3124_v2 }
 0x717   : > { %2802 = vmatprep.subr.bf16.mxu0 %v3124_v2 }
 0x718   : > { %v1597_v54 = vpop.permute.xlu1 %1596  ;;  %v1682_v16 = vpop.permute.xlu0 %1681 }
 0x719   : > { %2813 = vmatmul.mubr.msk.bf16.vlgmr.msra.gmra.mrb[20].mxu1 %vm827_vm4, %v1597_v54 }
 0x71a   : > { %2803 = vmatpush3.bf16.msra.mxu0 %v2943_v38  ;;  %2825 = vmatpush3.bf16.msra.mxu1 %v2940_v7 }
 0x71b   : > { %2816 = vmatprep.subr.bf16.mxu0 %v3124_v2  ;;  %2826 = vmatprep.subr.bf16.mxu1 %v3124_v2 }
 0x71c   : > { %2828 = vmatprep.mubr.msk.bf16.mxu1 %vm3125_vm1, %v3124_v2 }
 0x71d   : > { %2805 = vmatmul.mubr.msk.bf16.vlgmr.msra.gmra.mrb[20].mxu0 %vm827_vm4, %v3437_v62 }
 0x71e   : > { %2817 = vmatpush3.bf16.msra.mxu0 %v2941_v58  ;;  %2827 = vmatpush3.bf16.msra.mxu1 %v2942_v9 }
 0x71f   : > { %2818 = vmatprep.subr.bf16.mxu0 %v3124_v2  ;;  %2820 = vmatprep.mubr.msk.bf16.mxu0 %vm3125_vm1, %v3124_v2 }
 0x721   : > { %2829 = vmatmul.mubr.msk.bf16.vlgmr.msra.gmra.mrb[24].mxu1 %vm827_vm4, %v3447_v0 }
 0x722   : > { %2819 = vmatpush3.bf16.msra.mxu0 %v2943_v38  ;;  %2844 = vmatprep.mubr.msk.f32.mxu1 %vm3125_vm1, %v3124_v2 }
 0x723   : > { %2832 = vmatprep.subr.bf16.mxu0 %v3124_v2 }
 0x725   : > { %2821 = vmatmul.mubr.msk.bf16.vlgmr.msra.gmra.mrb[24].mxu0 %vm827_vm4, %v1366_v59 }
 0x726   : > { %2836 = vmatprep.mubr.msk.bf16.mxu0 %vm3125_vm1, %v3124_v2  ;;  %2833 = vmatpush3.bf16.msra.mxu0 %v2944_v24 }
 0x727   : > { %2834 = vmatprep.subr.bf16.mxu0 %v3124_v2 }
 0x72a   : > { %2835 = vmatpush3.bf16.msra.mxu0 %v2945_v25 }
 0x72b   : > { %2853 = vmatprep.subr.bf16.mxu0 %v3124_v2 }
 0x7e8   : > { %v1416_v62 = vpop.f32.mrb[16].mxu0 }
 0x7e9   : > { %v3550_v39 = vadd.f32 %v3473_v11, %v1416_v62  ;;  %v2790_v40 = vpop.f32.mrb[17].mxu0 }
 0x7ea   : > { %v1419_v41 = vpop.f32.mrb[18].mxu0 }
 0x7eb   : > { %v3553_v42 = vadd.f32 %v3476_v28, %v1419_v41  ;;  %v2791_v0 = vpop.f32.mrb[19].mxu0 }
 0x7ec   : > { %v1647_v43 = vpop.f32.mrb[20].mxu1 }
 0x7ed   : > { %v2814_v44 = vpop.f32.mrb[21].mxu1 }
 0x7ee   : > { %v1650_v45 = vpop.f32.mrb[22].mxu1 }
 0x7ef   : > { %v2815_v46 = vpop.f32.mrb[23].mxu1 }
 0x7f0   : > { %v1588_v48 = vpop.f32.mrb[20].mxu0  ;;  %v2608_v46 = vld [vmem:[%s3770_s9 + $0x4] ss:$0 sm:$0xff] }
 0x7f1   : > { %v1648_v53 = vadd.f32 %v1647_v43, %v1588_v48  ;;  %v2806_v55 = vpop.f32.mrb[21].mxu0  ;;  %v1481_v48 = vadd.f32 %v2608_v46, %v3550_v39 }
 0x7f2   : > { %v1591_v56 = vpop.f32.mrb[22].mxu0 }
 0x7f3   : > { %v1659_v11 = vadd.f32 %v2626_v52, %v1648_v53  ;;  %v1651_v57 = vadd.f32 %v1650_v45, %v1591_v56  ;;  %v2807_v60 = vpop.f32.mrb[23].mxu0  ;;  %v2609_v45 = vld [vmem:[%s3770_s9 + $0x5] ss:$0 sm:$0xff] }
 0x7f4   : > { %v1785_v61 = vpop.f32.mrb[24].mxu1  ;;  %v1488_v56 = vadd.f32 %v2609_v45, %v1481_v48 }
 0x7f5   : > { %v1666_v28 = vadd.f32 %v3516_v50, %v1659_v11  ;;  %v1660_v63 = vadd.f32 %v2626_v52, %v1651_v57  ;;  %v2830_v35 = vpop.f32.mrb[25].mxu1 }
 0x7f6   : > { %v1788_v1 = vpop.f32.mrb[26].mxu1  ;;  %v2610_v60 = vmul.f32 -1.442695, %v1488_v56 }
 0x7f7   : > { %v2628_v3 = vmul.f32 -1.442695, %v1666_v28  ;;  %v1667_v4 = vadd.f32 %v3516_v50, %v1660_v63  ;;  %v2831_v5 = vpop.f32.mrb[27].mxu1 }
 0x7f8   : > { %v1744_v37 = vpop.f32.mrb[24].mxu0 }
 0x7f9   : > { %3000 = vpow2.f32 %v2628_v3  ;;  %v2629_v6 = vmul.f32 -1.442695, %v1667_v4  ;;  %v1786_v7 = vadd.f32 %v1785_v61, %v1744_v37  ;;  %v2822_v8 = vpop.f32.mrb[25].mxu0 }
 0x7fa   : > { %v1747_v47 = vpop.f32.mrb[26].mxu0 }
 0x7fb   : > { %3002 = vpow2.f32 %v2629_v6  ;;  %v3560_v51 = vadd.f32 %v2626_v52, %v1786_v7  ;;  %v1789_v32 = vadd.f32 %v1788_v1, %v1747_v47  ;;  %v2823_v9 = vpop.f32.mrb[27].mxu0 }
 0x7fd   : > { %v3562_v10 = vadd.f32 %v2626_v52, %v1789_v32 }
 0x803   : > { %v3001_v12 = vpop.eup %3000 }
 0x804   : > { %v1674_v13 = vadd.f32 1.0, %v3001_v12 }
 0x805   : > { %v3003_v14 = vpop.eup %3002 }
 0x806   : > { %3004 = vrcp.f32 %v1674_v13  ;;  %v1675_v15 = vadd.f32 1.0, %v3003_v14 }
 0x808   : > { %3006 = vrcp.f32 %v1675_v15 }
 0x810   : > { %v3005_v17 = vpop.eup %3004 }
 0x811   : > { %v1684_v18 = vmul.f32 %v3005_v17, %v1682_v16  ;;  %v1698_v31 = vsub.f32 1.0, %v3005_v17 }
 0x812   : > { %v3007_v19 = vpop.eup %3006 }
 0x813   : > { %v1685_v29 = vmul.f32 %v3007_v19, %v1682_v16  ;;  %1688 = vrot.lane.b32.xlu1 %v1684_v18, %s3126_s28  ;;  %v1699_v36 = vsub.f32 1.0, %v3007_v19 }
 0x815   : > { %1690 = vrot.lane.b32.xlu0 %v1685_v29, %s3126_s28 }
 0x885   : > { %v1689_v20 = vpop.permute.xlu1 %1688 }
 0x886   : > { %v1694_v21 = vadd.f32 %v1689_v20, %v1659_v11 }
 0x887   : > { %v1691_v22 = vpop.permute.xlu0 %1690 }
 0x888   : > { %3008 = vtanh.f32 %v1694_v21  ;;  %v1695_v23 = vadd.f32 %v1691_v22, %v1660_v63 }
 0x88a   : > { %3010 = vtanh.f32 %v1695_v23 }
 0x892   : > { %v3009_v26 = vpop.eup %3008 }
 0x893   : > { %1702 = vrot.lane.b32.xlu1 %v3009_v26, %s3127_s0 }
 0x894   : > { %v3011_v27 = vpop.eup %3010 }
 0x895   : > { %1704 = vrot.lane.b32.xlu0 %v3011_v27, %s3127_s0 }
 0x905   : > { %v1703_v30 = vpop.permute.xlu1 %1702 }
 0x906   : > { %v3576_v58 = vmul.f32 %v1703_v30, %v1698_v31 }
 0x907   : > { %v1705_v49 = vpop.permute.xlu0 %1704 }
 0x908   : > { %v3578_v59 = vmul.f32 %v1705_v49, %v1699_v36 }
 0x90a   : > { %v1794_v38 = vpack.c.bf16 %v3578_v59, %v3576_v58 }
 0x90c   : > { %1801 = vrot.lane.b32.xlu1 %v1794_v38, %s3127_s0 }
 0x97e   : > { %v1802_v54 = vpop.permute.xlu1 %1801 }
 0x97f   : > { %2837 = vmatmul.mubr.msk.bf16.vlgmr.msra.gmra.mrb[28].mxu0 %vm827_vm4, %v1802_v54 }
 0x980   : > { %2857 = vmatprep.mubr.msk.bf16.mxu0 %vm3125_vm1, %v3124_v2 }
 0xa52   : > { %v1852_v62 = vpop.f32.mrb[28].mxu0 }
 0xa53   : > { %v1853_v40 = vadd.f32 %v3516_v50, %v1852_v62  ;;  %v2838_v41 = vpop.f32.mrb[29].mxu0 }
 0xa54   : > { %v1855_v0 = vpop.f32.mrb[30].mxu0 }
 0xa55   : > { %v1856_v43 = vadd.f32 %v3516_v50, %v1855_v0  ;;  %1875 = vrot.lane.b32.xlu0 %v1853_v40, %s3126_s28  ;;  %v2839_v44 = vpop.f32.mrb[31].mxu0  ;;  %v1859_v52 = vadd.f32 %v1853_v40, %v3560_v51  ;;  %v1482_v50 = vadd.f32 %v2608_v46, %v3553_v42 }
 0xa57   : > { %1877 = vrot.lane.b32.xlu1 %v1856_v43, %s3126_s28  ;;  %v1860_v53 = vadd.f32 %v1856_v43, %v3562_v10  ;;  %v2639_v55 = vmul.f32 -1.442695, %v1859_v52  ;;  %v1489_v57 = vadd.f32 %v2609_v45, %v1482_v50 }
 0xa59   : > { %1503 = vrot.lane.b32.xlu0 %v2609_v45, %s3126_s28  ;;  %v2640_v11 = vmul.f32 -1.442695, %v1860_v53  ;;  %3012 = vpow2.f32 %v2639_v55  ;;  %v2611_v61 = vmul.f32 -1.442695, %v1489_v57 }
 0xa5b   : > { %3014 = vpow2.f32 %v2640_v11 }
 0xa5c   : > { %3016 = vpow2.f32 %v2610_v60 }
 0xa5d   : > { %3018 = vpow2.f32 %v2611_v61 }
 0xa63   : > { %v3013_v28 = vpop.eup %3012 }
 0xa64   : > { %v1867_v35 = vadd.f32 1.0, %v3013_v28  ;;  %v3129_v28 = vmov 0  }
 0xa65   : > { %v3015_v63 = vpop.eup %3014  ;;  %2927 = vset.pattern.permute.xlu1 %v3129_v28  ;;  %2926 = vset.pattern.permute.xlu0 %v3129_v28 }
 0xa66   : > { %v3017_v39 = vpop.eup %3016  ;;  %v1868_v1 = vadd.f32 1.0, %v3015_v63  ;;  %3020 = vrcp.f32 %v1867_v35  ;;  %v2643_v63 = vld [vmem:[#allocation2] ss:$0 sm:$0xff] }
 0xa67   : > { %v3019_v3 = vpop.eup %3018  ;;  %v1496_v42 = vadd.f32 1.0, %v3017_v39 }
 0xa68   : > { %3022 = vrcp.f32 %v1868_v1  ;;  %v1497_v4 = vadd.f32 1.0, %v3019_v3 }
 0xa69   : > { %3024 = vrcp.f32 %v1496_v42 }
 0xa6a   : > { %3026 = vrcp.f32 %v1497_v4 }
 0xa70   : > { %v3021_v5 = vpop.eup %3020 }
 0xa71   : > { %v1895_v30 = vsub.f32 1.0, %v3021_v5  ;;  %v1907_v40 = vmul.f32 %v3021_v5, %v3576_v58 }
 0xa72   : > { %v3023_v7 = vpop.eup %3022 }
 0xa73   : > { %v3025_v32 = vpop.eup %3024  ;;  %v1896_v49 = vsub.f32 1.0, %v3023_v7  ;;  %v1908_v41 = vmul.f32 %v3023_v7, %v3578_v59 }
 0xa74   : > { %v3027_v13 = vpop.eup %3026  ;;  %v1520_v38 = vsub.f32 1.0, %v3025_v32 }
 0xa75   : > { %v1521_v62 = vsub.f32 1.0, %v3027_v13 }
 0xac7   : > { %v1876_v37 = vpop.permute.xlu0 %1875 }
 0xac8   : > { %v1881_v6 = vmul.f32 %v3021_v5, %v1876_v37 }
 0xac9   : > { %v1878_v8 = vpop.permute.xlu1 %1877 }
 0xaca   : > { %v1882_v47 = vmul.f32 %v3023_v7, %v1878_v8  ;;  %1885 = vrot.lane.b32.xlu1 %v1881_v6, %s3126_s28 }
 0xacb   : > { %v1504_v9 = vpop.permute.xlu0 %1503 }
 0xacc   : > { %v1506_v12 = vmul.f32 %v3025_v32, %v1504_v9  ;;  %1887 = vrot.lane.b32.xlu0 %v1882_v47, %s3126_s28  ;;  %v1507_v14 = vmul.f32 %v3027_v13, %v1504_v9 }
 0xace   : > { %1510 = vrot.lane.b32.xlu1 %v1506_v12, %s3126_s28 }
 0xad0   : > { %1512 = vrot.lane.b32.xlu0 %v1507_v14, %s3126_s28 }
 0xb3c   : > { %v1886_v15 = vpop.permute.xlu1 %1885 }
 0xb3d   : > { %v1891_v29 = vadd.f32 %v1886_v15, %v3560_v51  ;;  %v2641_v51 = vld [vmem:[%s3771_s10] ss:$0 sm:$0xff] }
 0xb3e   : > { %v1888_v16 = vpop.permute.xlu0 %1887 }
 0xb3f   : > { %v1892_v21 = vadd.f32 %v1888_v16, %v3562_v10  ;;  %v2642_v10 = vld [vmem:[%s3772_s11] ss:$0 sm:$0xff] }
 0xb40   : > { %v1511_v17 = vpop.permute.xlu1 %1510 }
 0xb41   : > { %v1516_v18 = vadd.f32 %v1511_v17, %v1481_v48 }
 0xb42   : > { %v1513_v19 = vpop.permute.xlu0 %1512 }
 0xb43   : > { %3028 = vtanh.f32 %v1516_v18  ;;  %v1517_v20 = vadd.f32 %v1513_v19, %v1482_v50 }
 0xb45   : > { %3030 = vtanh.f32 %v1517_v20 }
 0xb46   : > { %3032 = vtanh.f32 %v1891_v29 }
 0xb47   : > { %3034 = vtanh.f32 %v1892_v21 }
 0xb4d   : > { %v3029_v22 = vpop.eup %3028 }
 0xb4e   : > { %1524 = vrot.lane.b32.xlu1 %v3029_v22, %s3127_s0 }
 0xb4f   : > { %v3031_v23 = vpop.eup %3030 }
 0xb50   : > { %1526 = vrot.lane.b32.xlu0 %v3031_v23, %s3127_s0  ;;  %v3033_v24 = vpop.eup %3032 }
 0xb51   : > { %v3035_v25 = vpop.eup %3034 }
 0xb52   : > { %1899 = vrot.lane.b32.xlu1 %v3033_v24, %s3127_s0 }
 0xb54   : > { %1901 = vrot.lane.b32.xlu0 %v3035_v25, %s3127_s0  ;;  %v3629_v25 = vld [vmem:[%s3765_s4 + $0x8] sm:$0xf] }
 0xb55   : > { %vm1978_vm6 = vcmp.gt.f32.partialorder %v3629_v25, 0.0 }
 0xb56   : > { %1917 = vrot.lane.b32.xlu1 %v2641_v51, %s3128_s2  ;;  %v3635_v51 = vld [vmem:[%s3765_s4] sm:$0xff] }
 0xb57   : > { %vm1977_vm7 = vcmp.gt.f32.partialorder %v3635_v51, 0.0 }
 0xb58   : > { %1928 = vrot.lane.b32.xlu0 %v2642_v10, %s3128_s2 }
 0xbc0   : > { %v1525_v26 = vpop.permute.xlu1 %1524 }
 0xbc1   : > { %v1530_v44 = vmul.f32 %v1525_v26, %v1520_v38 }
 0xbc2   : > { %v1527_v27 = vpop.permute.xlu0 %1526 }
 0xbc3   : > { %v1531_v45 = vmul.f32 %v1527_v27, %v1521_v62 }
 0xbc4   : > { %v1900_v31 = vpop.permute.xlu1 %1899 }
 0xbc5   : > { %v1905_v36 = vmul.f32 %v1900_v31, %v1895_v30 }
 0xbc6   : > { %v1902_v54 = vpop.permute.xlu0 %1901 }
 0xbc7   : > { %v1906_v0 = vmul.f32 %v1902_v54, %v1896_v49  ;;  %v1909_v46 = vadd.f32 %v1907_v40, %v1905_v36 }
 0xbc8   : > { %v1918_v43 = vpop.permute.xlu1 %1917 }
 0xbc9   : > { %v1910_v48 = vadd.f32 %v1908_v41, %v1906_v0  ;;  %v1920_v50 = vmul.f32 %v1918_v43, %v1530_v44  ;;  %v1921_v53 = vmul.f32 %v1918_v43, %v1531_v45 }
 0xbca   : > { %v1929_v52 = vpop.permute.xlu0 %1928 }
 0xbcb   : > { %v1931_v55 = vmul.f32 %v1929_v52, %v1909_v46  ;;  %v1932_v56 = vmul.f32 %v1929_v52, %v1910_v48 }
 0xbcd   : > { %v1933_v11 = vadd.f32 %v1931_v55, %v1920_v50  ;;  %v1934_v57 = vadd.f32 %v1932_v56, %v1921_v53 }
 0xbcf   : > { %1939 = vrot.lane.b32.xlu0 %v1934_v57, %s3127_s0  ;;  %1937 = vrot.lane.b32.xlu1 %v1933_v11, %s3127_s0  ;;  %s2659_s0 = sshll.u32 %s3283_s24, 4  ;;  %s554_s24 = sand.u32 1, %s3114_s27  }
 0xbd0   : > { %s564_s28 = scalar_lea.vmem %s3791_s19, %s2659_s0  ;;  %s555_s23 = scalar_lea.vmem [#allocation3], %s554_s24 }
 0xbd1   : > { %v2048_v19 = vld [vmem:[%s564_s28] sm:$0xff]  ;;  %v2049_v20 = vld [vmem:[%s564_s28 + $0x8] sm:$0xf]  ;;  %s2474_s25 = sshll.u32 %s555_s23, 4  ;;  %s2462_s18 = scalar_lea.sflag [#allocation4], %s554_s24  ;;  %s3721_s25 = int_to_ptr.vmem [resolvable:$true] %s2474_s25 }
 0xbd2   : > { %s3060_s19 = scalar_lea.vmem %s3721_s25, 16  ;;  %s3064_s28 = sshll.u32 %s3132_s12, 4  ;;  %s3065_s28 = int_to_ptr.vmem [resolvable:$false] %s3064_s28 }
 0xbd3   : > { %p3061_p11 = scmp.ne.s32.totalorder %s3721_s25, %s3060_s19  ;;  %s3066_s3 = scalar_lea.vmem %s3065_s28, 32 }
 0xbd4   : > { %p3067_p0 = scmp.lt.s32.totalorder %s3721_s25, %s3065_s28  ;;  %p3068_p1 = scmp.lt.s32.totalorder %s3066_s3, %s3060_s19 }
 0xbd5   : > { %p3062_p12 = pnand %p3061_p11, %p3264_p5 }
 0xbd6   : > { %p3069_p2 = por %p3068_p1, %p3067_p0 }
 0xbd7   : > { %p3063_p13 = pneg %p3062_p12 }
 0xbd9   : > { %p3070_p3 = pnand %p3069_p2, %p3063_p13 }
 0xc41   : > { %v1940_v58 = vpop.permute.xlu0 %1939  ;;  %v1938_v59 = vpop.permute.xlu1 %1937 }
 0xc42   : > { %v1947_v60 = vsel %vm1946_vm5, %v1940_v58, 0.0  ;;  %v1943_v61 = vsel %vm827_vm4, %v1938_v59, 0.0 }
 0xc43   : > { %1948 = vadd.xlane.f32.xlu0 %v1947_v60  ;;  %1944 = vadd.xlane.f32.xlu1 %v1943_v61 }
 0xcd0   : > { %v1949_v35 = vpop.xlane.xlu0 %1948  ;;  %v1945_v39 = vpop.xlane.xlu1 %1944 }
 0xcd1   : > { %v1958_v1 = vadd.f32 %v2643_v63, %v1949_v35  ;;  %v1957_v3 = vadd.f32 %v2643_v63, %v1945_v39 }
 0xcd3   : > { %v1960_v42 = vmul.f32 %v1958_v1, %v1958_v1  ;;  %v1959_v4 = vmul.f32 %v1957_v3, %v1957_v3 }
 0xcd5   : > { %v1962_v5 = vmul.f32 %v1960_v42, %v1958_v1  ;;  %v1961_v37 = vmul.f32 %v1959_v4, %v1957_v3 }
 0xcd7   : > { %v1964_v6 = vmul.f32 0.044715, %v1962_v5  ;;  %v1963_v7 = vmul.f32 0.044715, %v1961_v37 }
 0xcd9   : > { %v1966_v8 = vadd.f32 %v1964_v6, %v1958_v1  ;;  %v1965_v47 = vadd.f32 %v1963_v7, %v1957_v3 }
 0xcdb   : > { %v1968_v32 = vmul.f32 0.7978846, %v1966_v8  ;;  %v1967_v9 = vmul.f32 0.7978846, %v1965_v47 }
 0xcdd   : > { %3036 = vtanh.f32 %v1968_v32 }
 0xcde   : > { %3038 = vtanh.f32 %v1967_v9 }
 0xce7   : > { %v3037_v12 = vpop.eup %3036 }
 0xce8   : > { %v3039_v13 = vpop.eup %3038  ;;  %v1972_v14 = vadd.f32 1.0, %v3037_v12 }
 0xce9   : > { %v1971_v15 = vadd.f32 1.0, %v3039_v13 }
 0xcea   : > { %v1974_v16 = vmul.f32 0.5, %v1972_v14 }
 0xceb   : > { %v1973_v17 = vmul.f32 0.5, %v1971_v15 }
 0xcec   : > { %v1976_v18 = vmul.f32 %v1974_v16, %v1958_v1 }
 0xced   : > { %v1975_v29 = vmul.f32 %v1973_v17, %v1957_v3 }
 0xcee   : > { %1986 = vperm.xlu1 %2927, %v1976_v18   ;;  %v2051_v23 = vadd.f32 %v2049_v20, %v1976_v18 }
 0xcef   : > { %1981 = vperm.xlu0 %2926, %v1975_v29   ;;  %v2050_v21 = vadd.f32 %v2048_v19, %v1975_v29 }
 0xcf0   : > { %v2054_v24 = vmul.f32 10.0, %v2051_v23 }
 0xcf1   : > { %v2053_v22 = vmul.f32 10.0, %v2050_v21 }
 0xcf3   : > { %2057 = vperm.xlu1 %2927, %v2053_v22  }
 0xcf7   : > { %2062 = vperm.xlu1 %2927, %v2054_v24  }
 0xd6d   : > { %v1987_v10 = vpop.permute.xlu1 %1986 }
 0xd6e   : > { %v1982_v26 = vpop.permute.xlu0 %1981  ;;  %v1990_v27 = vsel %vm1978_vm6, %v1987_v10, -1e+30 }
 0xd6f   : > { %v1989_v30 = vsel %vm1977_vm7, %v1982_v26, -1e+30  ;;  %v1993_v31 = vsel %vm1992_vm8, %v1990_v27, -inf }
 0xd70   : > { %v1991_v36 = vsel %vm638_vm3, %v1989_v30, -inf }
 0xd71   : > { %v1994_v49 = vmax.f32 %v1991_v36, %v1993_v31 }
 0xd72   : > { %v2058_v38 = vpop.permute.xlu1 %2057 }
 0xd73   : > { %v1995_v54 = vrot.slane %v1994_v49, 4  ;;  %v2065_v40 = vsel %vm1977_vm7, %v2058_v38, -1e+30 }
 0xd74   : > { %v2067_v44 = vsel %vm638_vm3, %v2065_v40, -inf }
 0xd75   : > { %v1996_v62 = vmax.f32 %v1994_v49, %v1995_v54 }
 0xd76   : > { %v2063_v41 = vpop.permute.xlu1 %2062 }
 0xd77   : > { %v1997_v0 = vrot.slane %v1996_v62, 2  ;;  %v2066_v43 = vsel %vm1978_vm6, %v2063_v41, -1e+30 }
 0xd78   : > { %v2068_v45 = vsel %vm1992_vm8, %v2066_v43, -inf }
 0xd79   : > { %v2069_v46 = vmax.f32 %v2067_v44, %v2068_v45  ;;  %v1998_v48 = vmax.f32 %v1996_v62, %v1997_v0 }
 0xd7b   : > { %v2070_v52 = vrot.slane %v2069_v46, 4  ;;  %v1999_v50 = vrot.slane %v1998_v48, 1 }
 0xd7d   : > { %v2071_v53 = vmax.f32 %v2069_v46, %v2070_v52  ;;  %v2000_v55 = vmax.f32 %v1998_v48, %v1999_v50 }
 0xd7f   : > { %v2072_v56 = vrot.slane %v2071_v53, 2  ;;  %v2002_v11 = vmul.f32 %v3629_v25, %v2000_v55  ;;  %v2001_v57 = vmul.f32 %v3635_v51, %v2000_v55 }
 0xd81   : > { %v2006_v58 = vsel %vm1992_vm8, %v2002_v11, 0.0  ;;  %v2003_v59 = vsel %vm638_vm3, %v2001_v57, 0.0  ;;  %v2073_v60 = vmax.f32 %v2071_v53, %v2072_v56 }
 0xd82   : > { %2007 = vadd.xlane.f32.xlu0 %v2006_v58  ;;  %2004 = vadd.xlane.f32.xlu1 %v2003_v59 }
 0xd83   : > { %v2074_v61 = vrot.slane %v2073_v60, 1 }
 0xd85   : > { %v2075_v28 = vmax.f32 %v2073_v60, %v2074_v61 }
 0xd87   : > { %v2076_v63 = vmul.f32 %v3635_v51, %v2075_v28  ;;  %v2077_v39 = vmul.f32 %v3629_v25, %v2075_v28 }
 0xd89   : > { %v2078_v35 = vsel %vm638_vm3, %v2076_v63, 0.0  ;;  %v2081_v1 = vsel %vm1992_vm8, %v2077_v39, 0.0 }
 0xd8a   : > { %2079 = vadd.xlane.f32.xlu1 %v2078_v35 }
 0xd8e   : > { %2082 = vadd.xlane.f32.xlu1 %v2081_v1 }
 0xe0f   : > { %v2008_v3 = vpop.xlane.xlu0 %2007  ;;  %v2005_v42 = vpop.xlane.xlu1 %2004 }
 0xe10   : > { %v2010_v4 = vsub.f32 %v1976_v18, %v2008_v3  ;;  %v2009_v5 = vsub.f32 %v1975_v29, %v2005_v42 }
 0xe12   : > { %v2013_v37 = vmul.f32 1.442695, %v2010_v4  ;;  %v2011_v6 = vmul.f32 1.442695, %v2009_v5  ;;  %v3130_v5 = vmov 0.0|0.0  }
 0xe13   : > { %2875 = vmatprep.subr.bf16.mxu1 %v3130_v5 }
 0xe14   : > { %3040 = vpow2.f32 %v2013_v37 }
 0xe15   : > { %3042 = vpow2.f32 %v2011_v6 }
 0xe17   : > { %v2080_v7 = vpop.xlane.xlu1 %2079 }
 0xe18   : > { %v2084_v8 = vsub.f32 %v2053_v22, %v2080_v7 }
 0xe1a   : > { %v2086_v47 = vmul.f32 1.442695, %v2084_v8 }
 0xe1b   : > { %v2083_v32 = vpop.xlane.xlu1 %2082 }
 0xe1c   : > { %3044 = vpow2.f32 %v2086_v47  ;;  %v2085_v9 = vsub.f32 %v2054_v24, %v2083_v32  ;;  %v2137_v32 = vld [vmem:[%s3767_s6] sm:$0xf] }
 0xe1e   : > { %v3041_v12 = vpop.eup %3040  ;;  %v2088_v13 = vmul.f32 1.442695, %v2085_v9 }
 0xe1f   : > { %v3043_v14 = vpop.eup %3042  ;;  %2022 = vperm.xlu0 %2926, %v3041_v12  }
 0xe20   : > { %3046 = vpow2.f32 %v2088_v13  ;;  %2017 = vperm.xlu1 %2927, %v3043_v14  }
 0xe26   : > { %v3045_v15 = vpop.eup %3044 }
 0xe27   : > { %2092 = vperm.xlu1 %2927, %v3045_v15  }
 0xe2a   : > { %v3047_v16 = vpop.eup %3046 }
 0xe2b   : > { %2097 = vperm.xlu1 %2927, %v3047_v16  }
 0xe9e   : > { %v2023_v17 = vpop.permute.xlu0 %2022 }
 0xe9f   : > { %v2026_v18 = vmul.f32 %v3629_v25, %v2023_v17  ;;  %v2018_v19 = vpop.permute.xlu1 %2017 }
 0xea0   : > { %v2025_v29 = vmul.f32 %v3635_v51, %v2018_v19 }
 0xea1   : > { %v2028_v20 = vsel %vm1992_vm8, %v2026_v18, 0.0 }
 0xea2   : > { %v2027_v21 = vsel %vm638_vm3, %v2025_v29, 0.0 }
 0xea3   : > { %v2029_v22 = vadd.f32 %v2028_v20, %v2027_v21  ;;  %v2948_v20 = vld [vmem:[%s3776_s15] sm:$0xff]  }
 0xea4   : > { %v2647_v21 = vld [vmem:[%s3775_s14] ss:$0 sm:$0xff] }
 0xea5   : > { %v2030_v23 = vrot.slane %v2029_v22, 4 }
 0xea6   : > { %v2093_v24 = vpop.permute.xlu1 %2092 }
 0xea7   : > { %v2031_v10 = vadd.f32 %v2030_v23, %v2029_v22  ;;  %v2100_v27 = vmul.f32 %v3635_v51, %v2093_v24 }
 0xea9   : > { %v2032_v26 = vrot.slane %v2031_v10, 2  ;;  %v2102_v49 = vsel %vm638_vm3, %v2100_v27, 0.0 }
 0xeaa   : > { %v2098_v30 = vpop.permute.xlu1 %2097 }
 0xeab   : > { %v2101_v31 = vmul.f32 %v3629_v25, %v2098_v30  ;;  %v2033_v36 = vadd.f32 %v2032_v26, %v2031_v10 }
 0xead   : > { %v2103_v38 = vsel %vm1992_vm8, %v2101_v31, 0.0  ;;  %v2034_v54 = vrot.slane %v2033_v36, 1 }
 0xeae   : > { %v2104_v62 = vadd.f32 %v2103_v38, %v2102_v49 }
 0xeaf   : > { %v2035_v40 = vadd.f32 %v2034_v54, %v2033_v36 }
 0xeb0   : > { %v2105_v41 = vrot.slane %v2104_v62, 4 }
 0xeb1   : > { %v2037_v0 = vmul.f32 %v3629_v25, %v2035_v40  ;;  %v2036_v43 = vmul.f32 %v3635_v51, %v2035_v40 }
 0xeb2   : > { %v2106_v44 = vadd.f32 %v2105_v41, %v2104_v62 }
 0xeb3   : > { %v2041_v45 = vsel %vm1992_vm8, %v2037_v0, 0.0  ;;  %v2038_v46 = vsel %vm638_vm3, %v2036_v43, 0.0  ;;  %v2949_v0 = vld [vmem:[%s3776_s15 + $0x8] sm:$0xff]  }
 0xeb4   : > { %v2107_v48 = vrot.slane %v2106_v44, 2  ;;  %2042 = vadd.xlane.f32.xlu0 %v2041_v45  ;;  %2039 = vadd.xlane.f32.xlu1 %v2038_v46 }
 0xeb6   : > { %v2108_v52 = vadd.f32 %v2107_v48, %v2106_v44 }
 0xeb8   : > { %v2109_v50 = vrot.slane %v2108_v52, 1 }
 0xeba   : > { %v2110_v53 = vadd.f32 %v2109_v50, %v2108_v52  ;;  %v2652_v52 = vld [vmem:[%s3777_s16] ss:$0 sm:$0xff] }
 0xebc   : > { %v2112_v55 = vmul.f32 %v3629_v25, %v2110_v53  ;;  %v2111_v56 = vmul.f32 %v3635_v51, %v2110_v53 }
 0xebe   : > { %v2116_v11 = vsel %vm1992_vm8, %v2112_v55, 0.0  ;;  %v2113_v57 = vsel %vm638_vm3, %v2111_v56, 0.0 }
 0xebf   : > { %2117 = vadd.xlane.f32.xlu1 %v2116_v11  ;;  %2114 = vadd.xlane.f32.xlu0 %v2113_v57 }
 0xf41   : > { %v2043_v58 = vpop.xlane.xlu0 %2042  ;;  %v2040_v59 = vpop.xlane.xlu1 %2039 }
 0xf42   : > { %3048 = vrcp.f32 %v2040_v59 }
 0xf43   : > { %3050 = vrcp.f32 %v2043_v58 }
 0xf4c   : > { %v2115_v60 = vpop.xlane.xlu0 %2114  ;;  %v2118_v61 = vpop.xlane.xlu1 %2117 }
 0xf4d   : > { %3052 = vrcp.f32 %v2115_v60  ;;  %v3049_v28 = vpop.eup %3048 }
 0xf4e   : > { %3054 = vrcp.f32 %v2118_v61  ;;  %v3051_v63 = vpop.eup %3050  ;;  %v2045_v39 = vmul.f32 %v3049_v28, %v3043_v14  ;;  %v2215_v14 = vld [vmem:[%s3768_s7] sm:$0x3] }
 0xf4f   : > { %v2047_v1 = vmul.f32 %v3051_v63, %v3041_v12 }
 0xf57   : > { %v3053_v35 = vpop.eup %3052 }
 0xf58   : > { %v3055_v25 = vpop.eup %3054  ;;  %v2120_v51 = vmul.f32 %v3053_v35, %v3045_v15  ;;  %v2947_v15 = vld [vmem:[%s3774_s13 + $0x8] sm:$0xff]  }
 0xf59   : > { %v2122_v3 = vmul.f32 %v3055_v25, %v3047_v16 }
 0xf5a   : > { %v2123_v42 = vmul.f32 %v2120_v51, %v2045_v39 }
 0xf5b   : > { %v2124_v4 = vmul.f32 %v2122_v3, %v2047_v1 }
 0xf5c   : > { %2127 = vperm.xlu0 %2926, %v2123_v42  }
 0xf5d   : > { %2132 = vperm.xlu1 %2927, %v2124_v4  }
 0xfdb   : > { %v2128_v37 = vpop.permute.xlu0 %2127 }
 0xfdc   : > { %v2135_v6 = vmul.f32 %v2128_v37, %v3348_v34  ;;  %v2133_v7 = vpop.permute.xlu1 %2132 }
 0xfdd   : > { %v2136_v8 = vmul.f32 %v3344_v33, %v2133_v7  ;;  %v2946_v33 = vld [vmem:[%s3774_s13] sm:$0xff]  }
 0xfde   : > { %2854 = vmatpush3.bf16.msra.mxu0 %v2946_v33 }
 0xfdf   : > { %v2876_v47 = vpack.c.bf16 %v2136_v8, %v2135_v6  ;;  %2855 = vmatprep.subr.bf16.mxu0 %v3124_v2 }
 0xfe1   : > { %2878 = vmatpush3.bf16.msk.msra.mxu1 %vm2877_vm10, %v2876_v47 }
 0xfe2   : > { %2847 = vmatprep.subr.bf16.mxu1 %v3124_v2  ;;  %2856 = vmatpush3.bf16.msra.mxu0 %v2947_v15 }
 0xfe3   : > { %2867 = vmatprep.subr.bf16.mxu0 %v3124_v2 }
 0xfe4   : > { %2845 = vmatmul.mubr.msk.f32.vlgmr.msra.gmra.mrb[28].mxu1 %vm2138_vm11, %v2137_v32 }
 0xfe5   : > { %2849 = vmatprep.mubr.msk.bf16.mxu1 %vm3125_vm1, %v3124_v2 }
0x10b7   : > { %v2211_v34 = vpop.f32.mrb[28].mxu1 }
0x10b8   : > { %v2216_v9 = vpack.c.bf16 %v2211_v34, %v2211_v34  ;;  %v2846_v12 = vpop.f32.mrb[29].mxu1 }
0x10ba   : > { %v2222_v13 = vsel %vm2220_vm12, %v2216_v9, 0 }
0x10bb   : > { %2848 = vmatpush3.bf16.msra.mxu1 %v2222_v13 }
0x10bc   : > { %2861 = vmatprep.subr.bf16.mxu1 %v3124_v2 }
0x10be   : > { %2850 = vmatmul.mubr.msk.bf16.vlgmr.msra.gmra.mrb[32].mxu1 %vm638_vm3, %v2215_v14 }
0x10bf   : > { %2863 = vmatprep.mubr.msk.bf16.mxu1 %vm3125_vm1, %v3124_v2 }
0x1191   : > { %v2258_v16 = vpop.f32.mrb[32].mxu1 }
0x1192   : > { %v2264_v17 = vpack.c.bf16 %v2258_v16, %v2258_v16  ;;  %v2851_v18 = vpop.f32.mrb[33].mxu1 }
0x1193   : > { %v2261_v19 = vpop.f32.mrb[34].mxu1 }
0x1194   : > { %v2852_v29 = vpop.f32.mrb[35].mxu1  ;;  %2858 = vmatmul.mubr.msk.bf16.vlgmr.msra.gmra.mrb[32].mxu0 %vm827_vm4, %v2264_v17 }
0x1195   : > { %2871 = vmatprep.mubr.msk.bf16.mxu0 %vm3125_vm1, %v3124_v2  ;;  %2868 = vmatpush3.bf16.msra.mxu0 %v2948_v20 }
0x1196   : > { %2869 = vmatprep.subr.bf16.mxu0 %v3124_v2 }
0x1199   : > { %2870 = vmatpush3.bf16.msra.mxu0 %v2949_v0 }
0x1267   : > { %v2325_v22 = vpop.f32.mrb[32].mxu0 }
0x1268   : > { %v2326_v23 = vadd.f32 %v2647_v21, %v2325_v22  ;;  %v2859_v24 = vpop.f32.mrb[33].mxu0 }
0x1269   : > { %v2328_v10 = vpop.f32.mrb[34].mxu0 }
0x126a   : > { %v2331_v26 = vmul.f32 %v2326_v23, %v2326_v23  ;;  %v2860_v27 = vpop.f32.mrb[35].mxu0 }
0x126c   : > { %v2332_v30 = vmul.f32 %v2331_v26, %v2326_v23 }
0x126e   : > { %v2333_v31 = vmul.f32 0.044715, %v2332_v30 }
0x1270   : > { %v2334_v36 = vadd.f32 %v2333_v31, %v2326_v23 }
0x1272   : > { %v2335_v49 = vmul.f32 0.7978846, %v2334_v36 }
0x1274   : > { %3056 = vtanh.f32 %v2335_v49 }
0x127e   : > { %v3057_v38 = vpop.eup %3056 }
0x127f   : > { %v2337_v54 = vadd.f32 1.0, %v3057_v38 }
0x1281   : > { %v2338_v62 = vmul.f32 0.5, %v2337_v54 }
0x1283   : > { %v2339_v40 = vmul.f32 %v2338_v62, %v2326_v23 }
0x1285   : > { %v2340_v2 = vpack.c.bf16 %v2339_v40, %v2339_v40 }
0x1287   : > { %v2342_v41 = vsel %vm2220_vm12, %v2340_v2, 0 }
0x1288   : > { %2862 = vmatpush3.bf16.msra.mxu1 %v2342_v41 }
0x128b   : > { %2864 = vmatmul.mubr.msk.bf16.vlgmr.msra.gmra.mrb[36].mxu1 %vm638_vm3, %v2215_v14 }
0x135e   : > { %v2378_v43 = vpop.f32.mrb[36].mxu1 }
0x135f   : > { %v2384_v44 = vpack.c.bf16 %v2378_v43, %v2378_v43  ;;  %v2865_v45 = vpop.f32.mrb[37].mxu1 }
0x1360   : > { %v2381_v46 = vpop.f32.mrb[38].mxu1 }
0x1361   : > { %2872 = vmatmul.mubr.msk.bf16.vlgmr.msra.gmra.mrb[36].mxu0 %vm827_vm4, %v2384_v44  ;;  %v2866_v48 = vpop.f32.mrb[39].mxu1 }
0x1434   : > { %v2445_v50 = vpop.f32.mrb[36].mxu0 }
0x1435   : > { %v2446_v53 = vadd.f32 %v2652_v52, %v2445_v50  ;;  %v2873_v55 = vpop.f32.mrb[37].mxu0 }
0x1436   : > { %v2448_v56 = vpop.f32.mrb[38].mxu0 }
0x1437   : > { %v2452_v11 = vsel %vm2451_vm13, %v2446_v53, 0.0  ;;  %v2874_v57 = vpop.f32.mrb[39].mxu0 }
0x1438   : > { %v2453_v58 = vrot.slane %v2452_v11, 4 }
0x143a   : > { %v2454_v59 = vadd.f32 %v2453_v58, %v2452_v11 }
0x143c   : > { %v2455_v60 = vrot.slane %v2454_v59, 2 }
0x143e   : > { %v2456_v61 = vadd.f32 %v2455_v60, %v2454_v59 }
0x1440   : > { %v2457_v28 = vrot.slane %v2456_v61, 1 }
0x1442   : > { %v2458_v63 = vadd.f32 %v2457_v28, %v2456_v61 }
0x1444   : > { %2460 = vst.msk [vmem:[%s555_s23] sm:$0x1] %vm2459_vm14, %v2458_v63 }
0x1445   : > { %3073 = shalt.err (!%p3070_p3)
}
0x1446   : > { %s3074_s24 = scalar_lea.hbm %s3719_s1, 16  ;;  %s3078_s2 = scalar_lea.hbm %s3778_s17, 32 }
0x1447   : > { %p3075_p4 = scmp.ne.s32.totalorder %s3719_s1, %s3074_s24  ;;  %p3079_p9 = scmp.lt.u32.totalorder %s3719_s1, %s3778_s17 }
0x1448   : > { %p3080_p10 = scmp.lt.u32.totalorder %s3078_s2, %s3074_s24  ;;  %p3082_p12 = scmp.lt.u32.totalorder %s3074_s24, %s3719_s1 }
0x1449   : > { %p3076_p7 = pnand %p3075_p4, %p3264_p5 }
0x144a   : > { %p3081_p11 = por %p3080_p10, %p3079_p9 }
0x144b   : > { %p3077_p8 = pneg %p3076_p7 }
0x144c   : > { %p3083_p13 = por %p3082_p12, %p3081_p11 }
0x144e   : > { %p3084_p0 = pnand %p3083_p13, %p3077_p8 }
0x1450   : > { %3087 = shalt.err (!%p3084_p0)
}
0x1451   : > { %2879 = dma.vmem_to_hbm [thread:$0]  (%p3264_p5), %s3721_s25, 16, %s3719_s1, %s2462_s18  }
0x1452 PF: > { %p2885_p1 = scmp.ge.s32.totalorder %s3122_s29, 2  ;;  %s2486_s3 = sand.u32 1, %s3110_s26  }
0x1453   : > { %s2487_s19 = scalar_lea.sflag [#allocation4], %s2486_s3 }
0x1454   : > { %p2882_p2 = pnand %p2885_p1, %p3268_p6 }
0x1456   : > { %3105 = dma.done.wait (!%p2882_p2), %s2487_s19, 16  }
0x1457   : > { %3107 = vsyncadd (!%p2882_p2), %s2487_s19, 4294967280  ;;  %s3792_s28 = sld [smem:[#allocation6_spill]]  ;;  %s3793_s24 = sld [smem:[#allocation7_spill]] }
0x1458   : > { %p29_p3 = scmp.ge.s32.totalorder %s3251_s30, 4   ;;  %s3794_s26 = smov %s3114_s27 }
0x1459   : > { %s3797_s29 = smov %s3251_s30 }
0x145a   :  { %31 = sbr.rel (!%p29_p3) target bundleno = 8 (0x8), region = 134 }
0x145d   : > { %s3795_s27 = smov %s3792_s28  ;;  %s3796_s28 = smov %s3793_s24 }
0x1461   :  { %2491 = vsyncpa [#allocation4], 1 }
0x1462   :  { %2493 = vsyncpa [#allocation4 + $0x1], 1 }

</bundles_post_ra>
